<compile_context>
chip_gen: v7x
topology: tpu7x:2x2x1
jax: 0.10.0
libtpu: 0.0.40
codegen_flags: <defaults>
</compile_context>

<pallas_src>
import math

import jax
import jax.numpy as jnp
from jax import lax
from jax.experimental import pallas as pl
from jax.experimental.pallas import tpu as pltpu


# ----------------------------- model config ---------------------------------
NUM_LAYERS = 2
EMBED_DIM = 32
NUM_HEADS = 4
HIDDEN_DIM = 64
HEAD_DIM = EMBED_DIM // NUM_HEADS
LN_EPS = 1e-5

BATCH = 2
SEQ = 8

# packed-parameter layout
LAYER_WA_COLS = 3 * EMBED_DIM + EMBED_DIM + HIDDEN_DIM   # wqkv | wo | w1 = 192
ROWS_PER_LAYER = 8                                        # vector rows per layer
VEC_ROWS = NUM_LAYERS * ROWS_PER_LAYER + 2                # + final ln gamma/beta
VEC_COLS = 128                                            # lane-aligned slab width


# ------------------------------ kernel ---------------------------------------
def _layer_norm(x, gamma, beta):
    # x: (N, E) f32, gamma/beta: (1, E). Biased variance over the last dim,
    # matching torch.nn.LayerNorm.
    mean = jnp.mean(x, axis=-1, keepdims=True)
    var = jnp.mean((x - mean) ** 2, axis=-1, keepdims=True)
    inv = lax.rsqrt(var + LN_EPS)
    return (x - mean) * inv * gamma + beta


def fused_encoder_kernel(x_ref, bias_ref, wa_ref, wb_ref, vec_ref, o_ref):
    # x_ref    : (B*S, E)         f32   activations (batch folded into rows)
    # bias_ref : (H*B*S, B*S)     f32   block-diagonal additive mask bias,
    #                                   replicated per head (0 keep / -1e9 mask)
    # wa_ref   : (E, L*192)       bf16  per-layer [wqkv | wo | w1] slabs
    # wb_ref   : (HIDDEN, L*E)    bf16  per-layer w2 slabs
    # vec_ref  : (VEC_ROWS, 128)  f32   all biases + LayerNorm gamma/beta
    x = x_ref[...]
    bias = bias_ref[...]
    wa = wa_ref[...]
    wb = wb_ref[...]
    vec = vec_ref[...]

    n_rows = x.shape[0]                     # B*S
    scale = 1.0 / math.sqrt(HEAD_DIM)

    for l in range(NUM_LAYERS):             # statically unrolled
        c0 = l * LAYER_WA_COLS
        wqkv = wa[:, c0:c0 + 3 * EMBED_DIM]                       # (E, 3E) bf16
        wo = wa[:, c0 + 3 * EMBED_DIM:c0 + 4 * EMBED_DIM]         # (E, E)  bf16
        w1 = wa[:, c0 + 4 * EMBED_DIM:c0 + 4 * EMBED_DIM + HIDDEN_DIM]  # (E, HID)
        w2 = wb[:, l * EMBED_DIM:(l + 1) * EMBED_DIM]             # (HID, E) bf16

        r = l * ROWS_PER_LAYER
        bqkv = vec[r + 0:r + 1, :3 * EMBED_DIM]
        bo = vec[r + 1:r + 2, :EMBED_DIM]
        ln1_g = vec[r + 2:r + 3, :EMBED_DIM]
        ln1_b = vec[r + 3:r + 4, :EMBED_DIM]
        b1 = vec[r + 4:r + 5, :HIDDEN_DIM]
        b2 = vec[r + 5:r + 6, :EMBED_DIM]
        ln2_g = vec[r + 6:r + 7, :EMBED_DIM]
        ln2_b = vec[r + 7:r + 8, :EMBED_DIM]

        # ---- multi-head self-attention (fused QKV projection) ---------------
        qkv = jnp.dot(x.astype(jnp.bfloat16), wqkv,
                      preferred_element_type=jnp.float32) + bqkv   # (N, 3E) f32
        qkv_b = qkv.astype(jnp.bfloat16)     # single cast, sliced per head below

        # Per-head scores stacked along sublanes -> one softmax for all heads.
        # (Head extraction stays a lane slice of width HEAD_DIM=8; acceptable
        # at these sizes.)
        s_list = []
        for h in range(NUM_HEADS):
            lo = h * HEAD_DIM
            qh = qkv_b[:, lo:lo + HEAD_DIM]
            kh = qkv_b[:, EMBED_DIM + lo:EMBED_DIM + lo + HEAD_DIM]
            # q @ k^T via dot_general contracting last dims (no XLU transpose)
            s_list.append(lax.dot_general(qh, kh, (((1,), (1,)), ((), ())),
                                          preferred_element_type=jnp.float32))
        scores = jnp.concatenate(s_list, axis=0)                   # (H*N, N) f32
        scores = scores * scale + bias
        scores = scores - jnp.max(scores, axis=-1, keepdims=True)
        p = jnp.exp(scores)
        p = p * pl.reciprocal(jnp.sum(p, axis=-1, keepdims=True), approx=True)
        p_b = p.astype(jnp.bfloat16)

        # Per-head attention output, concatenated along lanes -> one Wo matmul.
        o_list = []
        for h in range(NUM_HEADS):
            lo = h * HEAD_DIM
            vh = qkv_b[:, 2 * EMBED_DIM + lo:2 * EMBED_DIM + lo + HEAD_DIM]
            ph = p_b[h * n_rows:(h + 1) * n_rows, :]               # sublane slice
            o_list.append(jnp.dot(ph, vh, preferred_element_type=jnp.float32))
        o_heads = jnp.concatenate(o_list, axis=1)                  # (N, E) f32
        attn = jnp.dot(o_heads.astype(jnp.bfloat16), wo,
                       preferred_element_type=jnp.float32) + bo

        # residual + LayerNorm (dropout == identity at inference)
        x = _layer_norm(x + attn, ln1_g, ln1_b)

        # ---- feed-forward network -------------------------------------------
        h1 = jnp.dot(x.astype(jnp.bfloat16), w1,
                     preferred_element_type=jnp.float32) + b1
        h1 = jnp.maximum(h1, 0.0)
        ffn = jnp.dot(h1.astype(jnp.bfloat16), w2,
                      preferred_element_type=jnp.float32) + b2
        x = _layer_norm(x + ffn, ln2_g, ln2_b)

    # final LayerNorm, fused into the same kernel
    rf = NUM_LAYERS * ROWS_PER_LAYER
    final_g = vec[rf + 0:rf + 1, :EMBED_DIM]
    final_b = vec[rf + 1:rf + 2, :EMBED_DIM]
    o_ref[...] = _layer_norm(x, final_g, final_b)


# ------------------------------ wrapper ---------------------------------------
@jax.jit
def transformer_encoder(x, mask, params):
    """x: (B, S, E) f32; mask: (B, S, S) {0,1}, 0 -> masked."""
    B, S, E = x.shape
    N = B * S
    x2 = x.reshape(N, E)

    # Block-diagonal {0,1} mask over the folded (B*S, B*S) score matrix:
    # within-batch blocks carry the user mask, cross-batch entries are masked.
    mask_big = jnp.zeros((N, N), jnp.float32)
    for b in range(B):
        mask_big = lax.dynamic_update_slice(
            mask_big, mask[b].astype(jnp.float32), (b * S, b * S))
    bias = (mask_big - 1.0) * 1000000000.0          # 0 keep / -1e9 mask
    bias_all = jnp.tile(bias, (NUM_HEADS, 1))       # (H*N, N), one per stacked head

    out = pl.pallas_call(
        fused_encoder_kernel,
        out_shape=jax.ShapeDtypeStruct((N, E), jnp.float32),
        grid=(1,),
        in_specs=[
            pl.BlockSpec((N, E), lambda i: (0, 0)),
            pl.BlockSpec((NUM_HEADS * N, N), lambda i: (0, 0)),
            pl.BlockSpec(params["wa"].shape, lambda i: (0, 0)),
            pl.BlockSpec(params["wb"].shape, lambda i: (0, 0)),
            pl.BlockSpec(params["vec"].shape, lambda i: (0, 0)),
        ],
        out_specs=pl.BlockSpec((N, E), lambda i: (0, 0)),
        compiler_params=pltpu.CompilerParams(
            dimension_semantics=("arbitrary",)),
        # TODO(synk): on v7x (2 TCs) a grid=(B,) "parallel" split of the folded
        # rows could be re-introduced; at B*S=16 rows it is expected to tie.
    )(x2, bias_all, params["wa"], params["wb"], params["vec"])
    return out.reshape(B, S, E)


# --------------------------- deterministic init -------------------------------
def init_params(key):
    """Builds packed parameter slabs.

    wa  (E, NUM_LAYERS*192) bf16 : per-layer [Wqkv | Wo | W1], all (in, out)
    wb  (HIDDEN, NUM_LAYERS*E) bf16 : per-layer W2
    vec (VEC_ROWS, 128) f32 : rows per layer = [bqkv, bo, ln1_g, ln1_b, b1, b2,
                              ln2_g, ln2_b]; last two rows = final ln gamma/beta
    """
    def dense(k, fan_in, fan_out):
        # (in, out) so the kernel computes y = x @ W + b (== PyTorch x @ W.T + b)
        return jax.random.normal(k, (fan_in, fan_out), jnp.float32) * 0.05

    wa_parts, wb_parts = [], []
    vec = jnp.zeros((VEC_ROWS, VEC_COLS), jnp.float32)

    for l in range(NUM_LAYERS):
        keys = jax.random.split(key, 13)
        key = keys[-1]

        wq = dense(keys[0], EMBED_DIM, EMBED_DIM)
        wk = dense(keys[1], EMBED_DIM, EMBED_DIM)
        wv = dense(keys[2], EMBED_DIM, EMBED_DIM)
        wo = dense(keys[3], EMBED_DIM, EMBED_DIM)
        w1 = dense(keys[4], EMBED_DIM, HIDDEN_DIM)
        w2 = dense(keys[5], HIDDEN_DIM, EMBED_DIM)

        wqkv = jnp.concatenate([wq, wk, wv], axis=1)                # (E, 3E)
        wa_parts.append(jnp.concatenate([wqkv, wo, w1], axis=1))    # (E, 192)
        wb_parts.append(w2)                                         # (HID, E)

        r = l * ROWS_PER_LAYER
        vec = vec.at[r + 0, :3 * EMBED_DIM].set(
            jax.random.normal(keys[6], (3 * EMBED_DIM,), jnp.float32) * 0.02)
        vec = vec.at[r + 1, :EMBED_DIM].set(
            jax.random.normal(keys[7], (EMBED_DIM,), jnp.float32) * 0.02)
        vec = vec.at[r + 2, :EMBED_DIM].set(1.0)                    # ln1 gamma
        vec = vec.at[r + 3, :EMBED_DIM].set(
            jax.random.normal(keys[8], (EMBED_DIM,), jnp.float32) * 0.02)
        vec = vec.at[r + 4, :HIDDEN_DIM].set(
            jax.random.normal(keys[9], (HIDDEN_DIM,), jnp.float32) * 0.02)
        vec = vec.at[r + 5, :EMBED_DIM].set(
            jax.random.normal(keys[10], (EMBED_DIM,), jnp.float32) * 0.02)
        vec = vec.at[r + 6, :EMBED_DIM].set(1.0)                    # ln2 gamma
        vec = vec.at[r + 7, :EMBED_DIM].set(
            jax.random.normal(keys[11], (EMBED_DIM,), jnp.float32) * 0.02)

    rf = NUM_LAYERS * ROWS_PER_LAYER
    vec = vec.at[rf + 0, :EMBED_DIM].set(1.0)                       # final gamma
    # final beta (row rf+1) stays zero

    wa = jnp.concatenate(wa_parts, axis=1).astype(jnp.bfloat16)
    wb = jnp.concatenate(wb_parts, axis=1).astype(jnp.bfloat16)
    return {"wa": wa, "wb": wb, "vec": vec}


# --------------------------------- main ---------------------------------------
if __name__ == "__main__":
    key = jax.random.PRNGKey(0)
    k_x, k_p = jax.random.split(key)

    x = jax.random.normal(k_x, (BATCH, SEQ, EMBED_DIM), jnp.float32)
    # causal {0,1} mask, shape (B, S, S); 0 -> masked
    causal = jnp.tril(jnp.ones((SEQ, SEQ), jnp.float32))
    mask = jnp.broadcast_to(causal, (BATCH, SEQ, SEQ))

    params = init_params(k_p)

    out = transformer_encoder(x, mask, params)
    out = jax.block_until_ready(out)

    assert out.shape == (BATCH, SEQ, EMBED_DIM)
    assert bool(jnp.all(jnp.isfinite(out)))
    print("KERNEL_OK")
</pallas_src>

<mosaic_0001>
module attributes {stable_mosaic.version = 11 : i64} {
  func.func @fused_encoder_kernel(%arg0: i32, %arg1: memref<16x32xf32, #tpu.memory_space<vmem>>, %arg2: memref<64x16xf32, #tpu.memory_space<vmem>>, %arg3: memref<32x384xbf16, #tpu.memory_space<vmem>>, %arg4: memref<64x64xbf16, #tpu.memory_space<vmem>>, %arg5: memref<18x128xf32, #tpu.memory_space<vmem>>, %arg6: memref<16x32xf32, #tpu.memory_space<vmem>>) attributes {dimension_semantics = [#tpu.dimension_semantics<arbitrary>], iteration_bounds = array<i64: 1>, scalar_prefetch = 0 : i64, scratch_operands = 0 : i64, tpu.core_type = #tpu.core_type<tc>, window_params = [{pipeline_mode = #tpu.pipeline_mode<synchronous>, transform_indices = @transform_0, window_bounds = array<i64: 16, 32>}, {pipeline_mode = #tpu.pipeline_mode<synchronous>, transform_indices = @transform_1, window_bounds = array<i64: 64, 16>}, {pipeline_mode = #tpu.pipeline_mode<synchronous>, transform_indices = @transform_2, window_bounds = array<i64: 32, 384>}, {pipeline_mode = #tpu.pipeline_mode<synchronous>, transform_indices = @transform_3, window_bounds = array<i64: 64, 64>}, {pipeline_mode = #tpu.pipeline_mode<synchronous>, transform_indices = @transform_4, window_bounds = array<i64: 18, 128>}, {pipeline_mode = #tpu.pipeline_mode<synchronous>, transform_indices = @transform_5, window_bounds = array<i64: 16, 32>}]} {
    %c0 = arith.constant 0 : index
    %c0_0 = arith.constant 0 : index
    %0 = vector.load %arg1[%c0, %c0_0] : memref<16x32xf32, #tpu.memory_space<vmem>>, vector<16x32xf32>
    %c0_1 = arith.constant 0 : index
    %c0_2 = arith.constant 0 : index
    %1 = vector.load %arg2[%c0_1, %c0_2] : memref<64x16xf32, #tpu.memory_space<vmem>>, vector<64x16xf32>
    %c0_3 = arith.constant 0 : index
    %c0_4 = arith.constant 0 : index
    %2 = vector.load %arg3[%c0_3, %c0_4] : memref<32x384xbf16, #tpu.memory_space<vmem>>, vector<32x384xbf16>
    %c0_5 = arith.constant 0 : index
    %c0_6 = arith.constant 0 : index
    %3 = vector.load %arg4[%c0_5, %c0_6] : memref<64x64xbf16, #tpu.memory_space<vmem>>, vector<64x64xbf16>
    %c0_7 = arith.constant 0 : index
    %c0_8 = arith.constant 0 : index
    %4 = vector.load %arg5[%c0_7, %c0_8] : memref<18x128xf32, #tpu.memory_space<vmem>>, vector<18x128xf32>
    %5 = vector.extract_strided_slice %2 {offsets = [0, 0], sizes = [32, 96], strides = [1, 1]} : vector<32x384xbf16> to vector<32x96xbf16>
    %6 = vector.extract_strided_slice %2 {offsets = [0, 96], sizes = [32, 32], strides = [1, 1]} : vector<32x384xbf16> to vector<32x32xbf16>
    %7 = vector.extract_strided_slice %2 {offsets = [0, 128], sizes = [32, 64], strides = [1, 1]} : vector<32x384xbf16> to vector<32x64xbf16>
    %8 = vector.extract_strided_slice %3 {offsets = [0, 0], sizes = [64, 32], strides = [1, 1]} : vector<64x64xbf16> to vector<64x32xbf16>
    %9 = vector.extract_strided_slice %4 {offsets = [0, 0], sizes = [1, 96], strides = [1, 1]} : vector<18x128xf32> to vector<1x96xf32>
    %10 = vector.extract_strided_slice %4 {offsets = [1, 0], sizes = [1, 32], strides = [1, 1]} : vector<18x128xf32> to vector<1x32xf32>
    %11 = vector.extract_strided_slice %4 {offsets = [2, 0], sizes = [1, 32], strides = [1, 1]} : vector<18x128xf32> to vector<1x32xf32>
    %12 = vector.extract_strided_slice %4 {offsets = [3, 0], sizes = [1, 32], strides = [1, 1]} : vector<18x128xf32> to vector<1x32xf32>
    %13 = vector.extract_strided_slice %4 {offsets = [4, 0], sizes = [1, 64], strides = [1, 1]} : vector<18x128xf32> to vector<1x64xf32>
    %14 = vector.extract_strided_slice %4 {offsets = [5, 0], sizes = [1, 32], strides = [1, 1]} : vector<18x128xf32> to vector<1x32xf32>
    %15 = vector.extract_strided_slice %4 {offsets = [6, 0], sizes = [1, 32], strides = [1, 1]} : vector<18x128xf32> to vector<1x32xf32>
    %16 = vector.extract_strided_slice %4 {offsets = [7, 0], sizes = [1, 32], strides = [1, 1]} : vector<18x128xf32> to vector<1x32xf32>
    %17 = arith.truncf %0 : vector<16x32xf32> to vector<16x32xbf16>
    %cst = arith.constant dense<0.000000e+00> : vector<16x96xf32>
    %18 = tpu.matmul %17, %5, %cst {dimension_numbers = #tpu.dot_dimension_numbers<[1], [0], [0], [1], [0, 0, 1, 1], [], []>} : vector<16x32xbf16>, vector<32x96xbf16>, vector<16x96xf32> -> vector<16x96xf32>
    %19 = vector.broadcast %9 : vector<1x96xf32> to vector<16x96xf32>
    %20 = arith.addf %18, %19 : vector<16x96xf32>
    %21 = arith.truncf %20 : vector<16x96xf32> to vector<16x96xbf16>
    %22 = vector.extract_strided_slice %21 {offsets = [0, 0], sizes = [16, 8], strides = [1, 1]} : vector<16x96xbf16> to vector<16x8xbf16>
    %23 = vector.extract_strided_slice %21 {offsets = [0, 32], sizes = [16, 8], strides = [1, 1]} : vector<16x96xbf16> to vector<16x8xbf16>
    %cst_9 = arith.constant dense<0.000000e+00> : vector<16x16xf32>
    %24 = tpu.matmul %22, %23, %cst_9 {dimension_numbers = #tpu.dot_dimension_numbers<[1], [1], [0], [0], [0, 0, 1, 0], [], []>} : vector<16x8xbf16>, vector<16x8xbf16>, vector<16x16xf32> -> vector<16x16xf32>
    %25 = vector.extract_strided_slice %21 {offsets = [0, 8], sizes = [16, 8], strides = [1, 1]} : vector<16x96xbf16> to vector<16x8xbf16>
    %26 = vector.extract_strided_slice %21 {offsets = [0, 40], sizes = [16, 8], strides = [1, 1]} : vector<16x96xbf16> to vector<16x8xbf16>
    %cst_10 = arith.constant dense<0.000000e+00> : vector<16x16xf32>
    %27 = tpu.matmul %25, %26, %cst_10 {dimension_numbers = #tpu.dot_dimension_numbers<[1], [1], [0], [0], [0, 0, 1, 0], [], []>} : vector<16x8xbf16>, vector<16x8xbf16>, vector<16x16xf32> -> vector<16x16xf32>
    %28 = vector.extract_strided_slice %21 {offsets = [0, 16], sizes = [16, 8], strides = [1, 1]} : vector<16x96xbf16> to vector<16x8xbf16>
    %29 = vector.extract_strided_slice %21 {offsets = [0, 48], sizes = [16, 8], strides = [1, 1]} : vector<16x96xbf16> to vector<16x8xbf16>
    %cst_11 = arith.constant dense<0.000000e+00> : vector<16x16xf32>
    %30 = tpu.matmul %28, %29, %cst_11 {dimension_numbers = #tpu.dot_dimension_numbers<[1], [1], [0], [0], [0, 0, 1, 0], [], []>} : vector<16x8xbf16>, vector<16x8xbf16>, vector<16x16xf32> -> vector<16x16xf32>
    %31 = vector.extract_strided_slice %21 {offsets = [0, 24], sizes = [16, 8], strides = [1, 1]} : vector<16x96xbf16> to vector<16x8xbf16>
    %32 = vector.extract_strided_slice %21 {offsets = [0, 56], sizes = [16, 8], strides = [1, 1]} : vector<16x96xbf16> to vector<16x8xbf16>
    %cst_12 = arith.constant dense<0.000000e+00> : vector<16x16xf32>
    %33 = tpu.matmul %31, %32, %cst_12 {dimension_numbers = #tpu.dot_dimension_numbers<[1], [1], [0], [0], [0, 0, 1, 0], [], []>} : vector<16x8xbf16>, vector<16x8xbf16>, vector<16x16xf32> -> vector<16x16xf32>
    %34 = tpu.concatenate %24, %27, %30, %33 in 0 : vector<16x16xf32>, vector<16x16xf32>, vector<16x16xf32>, vector<16x16xf32> -> vector<64x16xf32>
    %cst_13 = arith.constant 0.353553385 : f32
    %35 = vector.broadcast %cst_13 : f32 to vector<64x16xf32>
    %36 = arith.mulf %34, %35 : vector<64x16xf32>
    %37 = arith.addf %36, %1 : vector<64x16xf32>
    %cst_14 = arith.constant dense<0xFF800000> : vector<64xf32>
    %38 = vector.multi_reduction <maximumf>, %37, %cst_14 [1] : vector<64x16xf32> to vector<64xf32>
    %39 = vector.shape_cast %38 : vector<64xf32> to vector<64x1xf32>
    %40 = vector.broadcast %39 : vector<64x1xf32> to vector<64x16xf32>
    %41 = arith.subf %37, %40 : vector<64x16xf32>
    %42 = math.exp %41 : vector<64x16xf32>
    %cst_15 = arith.constant dense<0.000000e+00> : vector<64xf32>
    %43 = vector.multi_reduction <add>, %42, %cst_15 [1] : vector<64x16xf32> to vector<64xf32>
    %44 = vector.shape_cast %43 : vector<64xf32> to vector<64x1xf32>
    %45 = tpu.reciprocal %44 {approx = true} : vector<64x1xf32> -> vector<64x1xf32>
    %46 = vector.broadcast %45 : vector<64x1xf32> to vector<64x16xf32>
    %47 = arith.mulf %42, %46 : vector<64x16xf32>
    %48 = arith.truncf %47 : vector<64x16xf32> to vector<64x16xbf16>
    %49 = vector.extract_strided_slice %21 {offsets = [0, 64], sizes = [16, 8], strides = [1, 1]} : vector<16x96xbf16> to vector<16x8xbf16>
    %50 = vector.extract_strided_slice %48 {offsets = [0, 0], sizes = [16, 16], strides = [1, 1]} : vector<64x16xbf16> to vector<16x16xbf16>
    %cst_16 = arith.constant dense<0.000000e+00> : vector<16x8xf32>
    %51 = tpu.matmul %50, %49, %cst_16 {dimension_numbers = #tpu.dot_dimension_numbers<[1], [0], [0], [1], [0, 0, 1, 1], [], []>} : vector<16x16xbf16>, vector<16x8xbf16>, vector<16x8xf32> -> vector<16x8xf32>
    %52 = vector.extract_strided_slice %21 {offsets = [0, 72], sizes = [16, 8], strides = [1, 1]} : vector<16x96xbf16> to vector<16x8xbf16>
    %53 = vector.extract_strided_slice %48 {offsets = [16, 0], sizes = [16, 16], strides = [1, 1]} : vector<64x16xbf16> to vector<16x16xbf16>
    %cst_17 = arith.constant dense<0.000000e+00> : vector<16x8xf32>
    %54 = tpu.matmul %53, %52, %cst_17 {dimension_numbers = #tpu.dot_dimension_numbers<[1], [0], [0], [1], [0, 0, 1, 1], [], []>} : vector<16x16xbf16>, vector<16x8xbf16>, vector<16x8xf32> -> vector<16x8xf32>
    %55 = vector.extract_strided_slice %21 {offsets = [0, 80], sizes = [16, 8], strides = [1, 1]} : vector<16x96xbf16> to vector<16x8xbf16>
    %56 = vector.extract_strided_slice %48 {offsets = [32, 0], sizes = [16, 16], strides = [1, 1]} : vector<64x16xbf16> to vector<16x16xbf16>
    %cst_18 = arith.constant dense<0.000000e+00> : vector<16x8xf32>
    %57 = tpu.matmul %56, %55, %cst_18 {dimension_numbers = #tpu.dot_dimension_numbers<[1], [0], [0], [1], [0, 0, 1, 1], [], []>} : vector<16x16xbf16>, vector<16x8xbf16>, vector<16x8xf32> -> vector<16x8xf32>
    %58 = vector.extract_strided_slice %21 {offsets = [0, 88], sizes = [16, 8], strides = [1, 1]} : vector<16x96xbf16> to vector<16x8xbf16>
    %59 = vector.extract_strided_slice %48 {offsets = [48, 0], sizes = [16, 16], strides = [1, 1]} : vector<64x16xbf16> to vector<16x16xbf16>
    %cst_19 = arith.constant dense<0.000000e+00> : vector<16x8xf32>
    %60 = tpu.matmul %59, %58, %cst_19 {dimension_numbers = #tpu.dot_dimension_numbers<[1], [0], [0], [1], [0, 0, 1, 1], [], []>} : vector<16x16xbf16>, vector<16x8xbf16>, vector<16x8xf32> -> vector<16x8xf32>
    %61 = tpu.concatenate %51, %54, %57, %60 in 1 : vector<16x8xf32>, vector<16x8xf32>, vector<16x8xf32>, vector<16x8xf32> -> vector<16x32xf32>
    %62 = arith.truncf %61 : vector<16x32xf32> to vector<16x32xbf16>
    %cst_20 = arith.constant dense<0.000000e+00> : vector<16x32xf32>
    %63 = tpu.matmul %62, %6, %cst_20 {dimension_numbers = #tpu.dot_dimension_numbers<[1], [0], [0], [1], [0, 0, 1, 1], [], []>} : vector<16x32xbf16>, vector<32x32xbf16>, vector<16x32xf32> -> vector<16x32xf32>
    %64 = vector.broadcast %10 : vector<1x32xf32> to vector<16x32xf32>
    %65 = arith.addf %63, %64 : vector<16x32xf32>
    %66 = arith.addf %0, %65 : vector<16x32xf32>
    %cst_21 = arith.constant dense<0.000000e+00> : vector<16xf32>
    %67 = vector.multi_reduction <add>, %66, %cst_21 [1] : vector<16x32xf32> to vector<16xf32>
    %68 = vector.shape_cast %67 : vector<16xf32> to vector<16x1xf32>
    %cst_22 = arith.constant 3.200000e+01 : f32
    %69 = vector.broadcast %cst_22 : f32 to vector<16x1xf32>
    %70 = arith.divf %68, %69 : vector<16x1xf32>
    %71 = vector.broadcast %70 : vector<16x1xf32> to vector<16x32xf32>
    %72 = arith.subf %66, %71 : vector<16x32xf32>
    %73 = arith.mulf %72, %72 : vector<16x32xf32>
    %cst_23 = arith.constant dense<0.000000e+00> : vector<16xf32>
    %74 = vector.multi_reduction <add>, %73, %cst_23 [1] : vector<16x32xf32> to vector<16xf32>
    %75 = vector.shape_cast %74 : vector<16xf32> to vector<16x1xf32>
    %cst_24 = arith.constant 3.200000e+01 : f32
    %76 = vector.broadcast %cst_24 : f32 to vector<16x1xf32>
    %77 = arith.divf %75, %76 : vector<16x1xf32>
    %cst_25 = arith.constant 9.99999974E-6 : f32
    %78 = vector.broadcast %cst_25 : f32 to vector<16x1xf32>
    %79 = arith.addf %77, %78 : vector<16x1xf32>
    %80 = math.rsqrt %79 : vector<16x1xf32>
    %81 = vector.broadcast %70 : vector<16x1xf32> to vector<16x32xf32>
    %82 = arith.subf %66, %81 : vector<16x32xf32>
    %83 = vector.broadcast %80 : vector<16x1xf32> to vector<16x32xf32>
    %84 = arith.mulf %82, %83 : vector<16x32xf32>
    %85 = vector.broadcast %11 : vector<1x32xf32> to vector<16x32xf32>
    %86 = arith.mulf %84, %85 : vector<16x32xf32>
    %87 = vector.broadcast %12 : vector<1x32xf32> to vector<16x32xf32>
    %88 = arith.addf %86, %87 : vector<16x32xf32>
    %89 = arith.truncf %88 : vector<16x32xf32> to vector<16x32xbf16>
    %cst_26 = arith.constant dense<0.000000e+00> : vector<16x64xf32>
    %90 = tpu.matmul %89, %7, %cst_26 {dimension_numbers = #tpu.dot_dimension_numbers<[1], [0], [0], [1], [0, 0, 1, 1], [], []>} : vector<16x32xbf16>, vector<32x64xbf16>, vector<16x64xf32> -> vector<16x64xf32>
    %91 = vector.broadcast %13 : vector<1x64xf32> to vector<16x64xf32>
    %92 = arith.addf %90, %91 : vector<16x64xf32>
    %cst_27 = arith.constant 0.000000e+00 : f32
    %93 = vector.broadcast %cst_27 : f32 to vector<16x64xf32>
    %94 = arith.maximumf %92, %93 : vector<16x64xf32>
    %95 = arith.truncf %94 : vector<16x64xf32> to vector<16x64xbf16>
    %cst_28 = arith.constant dense<0.000000e+00> : vector<16x32xf32>
    %96 = tpu.matmul %95, %8, %cst_28 {dimension_numbers = #tpu.dot_dimension_numbers<[1], [0], [0], [1], [0, 0, 1, 1], [], []>} : vector<16x64xbf16>, vector<64x32xbf16>, vector<16x32xf32> -> vector<16x32xf32>
    %97 = vector.broadcast %14 : vector<1x32xf32> to vector<16x32xf32>
    %98 = arith.addf %96, %97 : vector<16x32xf32>
    %99 = arith.addf %88, %98 : vector<16x32xf32>
    %cst_29 = arith.constant dense<0.000000e+00> : vector<16xf32>
    %100 = vector.multi_reduction <add>, %99, %cst_29 [1] : vector<16x32xf32> to vector<16xf32>
    %101 = vector.shape_cast %100 : vector<16xf32> to vector<16x1xf32>
    %cst_30 = arith.constant 3.200000e+01 : f32
    %102 = vector.broadcast %cst_30 : f32 to vector<16x1xf32>
    %103 = arith.divf %101, %102 : vector<16x1xf32>
    %104 = vector.broadcast %103 : vector<16x1xf32> to vector<16x32xf32>
    %105 = arith.subf %99, %104 : vector<16x32xf32>
    %106 = arith.mulf %105, %105 : vector<16x32xf32>
    %cst_31 = arith.constant dense<0.000000e+00> : vector<16xf32>
    %107 = vector.multi_reduction <add>, %106, %cst_31 [1] : vector<16x32xf32> to vector<16xf32>
    %108 = vector.shape_cast %107 : vector<16xf32> to vector<16x1xf32>
    %cst_32 = arith.constant 3.200000e+01 : f32
    %109 = vector.broadcast %cst_32 : f32 to vector<16x1xf32>
    %110 = arith.divf %108, %109 : vector<16x1xf32>
    %cst_33 = arith.constant 9.99999974E-6 : f32
    %111 = vector.broadcast %cst_33 : f32 to vector<16x1xf32>
    %112 = arith.addf %110, %111 : vector<16x1xf32>
    %113 = math.rsqrt %112 : vector<16x1xf32>
    %114 = vector.broadcast %103 : vector<16x1xf32> to vector<16x32xf32>
    %115 = arith.subf %99, %114 : vector<16x32xf32>
    %116 = vector.broadcast %113 : vector<16x1xf32> to vector<16x32xf32>
    %117 = arith.mulf %115, %116 : vector<16x32xf32>
    %118 = vector.broadcast %15 : vector<1x32xf32> to vector<16x32xf32>
    %119 = arith.mulf %117, %118 : vector<16x32xf32>
    %120 = vector.broadcast %16 : vector<1x32xf32> to vector<16x32xf32>
    %121 = arith.addf %119, %120 : vector<16x32xf32>
    %122 = vector.extract_strided_slice %2 {offsets = [0, 192], sizes = [32, 96], strides = [1, 1]} : vector<32x384xbf16> to vector<32x96xbf16>
    %123 = vector.extract_strided_slice %2 {offsets = [0, 288], sizes = [32, 32], strides = [1, 1]} : vector<32x384xbf16> to vector<32x32xbf16>
    %124 = vector.extract_strided_slice %2 {offsets = [0, 320], sizes = [32, 64], strides = [1, 1]} : vector<32x384xbf16> to vector<32x64xbf16>
    %125 = vector.extract_strided_slice %3 {offsets = [0, 32], sizes = [64, 32], strides = [1, 1]} : vector<64x64xbf16> to vector<64x32xbf16>
    %126 = vector.extract_strided_slice %4 {offsets = [8, 0], sizes = [1, 96], strides = [1, 1]} : vector<18x128xf32> to vector<1x96xf32>
    %127 = vector.extract_strided_slice %4 {offsets = [9, 0], sizes = [1, 32], strides = [1, 1]} : vector<18x128xf32> to vector<1x32xf32>
    %128 = vector.extract_strided_slice %4 {offsets = [10, 0], sizes = [1, 32], strides = [1, 1]} : vector<18x128xf32> to vector<1x32xf32>
    %129 = vector.extract_strided_slice %4 {offsets = [11, 0], sizes = [1, 32], strides = [1, 1]} : vector<18x128xf32> to vector<1x32xf32>
    %130 = vector.extract_strided_slice %4 {offsets = [12, 0], sizes = [1, 64], strides = [1, 1]} : vector<18x128xf32> to vector<1x64xf32>
    %131 = vector.extract_strided_slice %4 {offsets = [13, 0], sizes = [1, 32], strides = [1, 1]} : vector<18x128xf32> to vector<1x32xf32>
    %132 = vector.extract_strided_slice %4 {offsets = [14, 0], sizes = [1, 32], strides = [1, 1]} : vector<18x128xf32> to vector<1x32xf32>
    %133 = vector.extract_strided_slice %4 {offsets = [15, 0], sizes = [1, 32], strides = [1, 1]} : vector<18x128xf32> to vector<1x32xf32>
    %134 = arith.truncf %121 : vector<16x32xf32> to vector<16x32xbf16>
    %cst_34 = arith.constant dense<0.000000e+00> : vector<16x96xf32>
    %135 = tpu.matmul %134, %122, %cst_34 {dimension_numbers = #tpu.dot_dimension_numbers<[1], [0], [0], [1], [0, 0, 1, 1], [], []>} : vector<16x32xbf16>, vector<32x96xbf16>, vector<16x96xf32> -> vector<16x96xf32>
    %136 = vector.broadcast %126 : vector<1x96xf32> to vector<16x96xf32>
    %137 = arith.addf %135, %136 : vector<16x96xf32>
    %138 = arith.truncf %137 : vector<16x96xf32> to vector<16x96xbf16>
    %139 = vector.extract_strided_slice %138 {offsets = [0, 0], sizes = [16, 8], strides = [1, 1]} : vector<16x96xbf16> to vector<16x8xbf16>
    %140 = vector.extract_strided_slice %138 {offsets = [0, 32], sizes = [16, 8], strides = [1, 1]} : vector<16x96xbf16> to vector<16x8xbf16>
    %cst_35 = arith.constant dense<0.000000e+00> : vector<16x16xf32>
    %141 = tpu.matmul %139, %140, %cst_35 {dimension_numbers = #tpu.dot_dimension_numbers<[1], [1], [0], [0], [0, 0, 1, 0], [], []>} : vector<16x8xbf16>, vector<16x8xbf16>, vector<16x16xf32> -> vector<16x16xf32>
    %142 = vector.extract_strided_slice %138 {offsets = [0, 8], sizes = [16, 8], strides = [1, 1]} : vector<16x96xbf16> to vector<16x8xbf16>
    %143 = vector.extract_strided_slice %138 {offsets = [0, 40], sizes = [16, 8], strides = [1, 1]} : vector<16x96xbf16> to vector<16x8xbf16>
    %cst_36 = arith.constant dense<0.000000e+00> : vector<16x16xf32>
    %144 = tpu.matmul %142, %143, %cst_36 {dimension_numbers = #tpu.dot_dimension_numbers<[1], [1], [0], [0], [0, 0, 1, 0], [], []>} : vector<16x8xbf16>, vector<16x8xbf16>, vector<16x16xf32> -> vector<16x16xf32>
    %145 = vector.extract_strided_slice %138 {offsets = [0, 16], sizes = [16, 8], strides = [1, 1]} : vector<16x96xbf16> to vector<16x8xbf16>
    %146 = vector.extract_strided_slice %138 {offsets = [0, 48], sizes = [16, 8], strides = [1, 1]} : vector<16x96xbf16> to vector<16x8xbf16>
    %cst_37 = arith.constant dense<0.000000e+00> : vector<16x16xf32>
    %147 = tpu.matmul %145, %146, %cst_37 {dimension_numbers = #tpu.dot_dimension_numbers<[1], [1], [0], [0], [0, 0, 1, 0], [], []>} : vector<16x8xbf16>, vector<16x8xbf16>, vector<16x16xf32> -> vector<16x16xf32>
    %148 = vector.extract_strided_slice %138 {offsets = [0, 24], sizes = [16, 8], strides = [1, 1]} : vector<16x96xbf16> to vector<16x8xbf16>
    %149 = vector.extract_strided_slice %138 {offsets = [0, 56], sizes = [16, 8], strides = [1, 1]} : vector<16x96xbf16> to vector<16x8xbf16>
    %cst_38 = arith.constant dense<0.000000e+00> : vector<16x16xf32>
    %150 = tpu.matmul %148, %149, %cst_38 {dimension_numbers = #tpu.dot_dimension_numbers<[1], [1], [0], [0], [0, 0, 1, 0], [], []>} : vector<16x8xbf16>, vector<16x8xbf16>, vector<16x16xf32> -> vector<16x16xf32>
    %151 = tpu.concatenate %141, %144, %147, %150 in 0 : vector<16x16xf32>, vector<16x16xf32>, vector<16x16xf32>, vector<16x16xf32> -> vector<64x16xf32>
    %cst_39 = arith.constant 0.353553385 : f32
    %152 = vector.broadcast %cst_39 : f32 to vector<64x16xf32>
    %153 = arith.mulf %151, %152 : vector<64x16xf32>
    %154 = arith.addf %153, %1 : vector<64x16xf32>
    %cst_40 = arith.constant dense<0xFF800000> : vector<64xf32>
    %155 = vector.multi_reduction <maximumf>, %154, %cst_40 [1] : vector<64x16xf32> to vector<64xf32>
    %156 = vector.shape_cast %155 : vector<64xf32> to vector<64x1xf32>
    %157 = vector.broadcast %156 : vector<64x1xf32> to vector<64x16xf32>
    %158 = arith.subf %154, %157 : vector<64x16xf32>
    %159 = math.exp %158 : vector<64x16xf32>
    %cst_41 = arith.constant dense<0.000000e+00> : vector<64xf32>
    %160 = vector.multi_reduction <add>, %159, %cst_41 [1] : vector<64x16xf32> to vector<64xf32>
    %161 = vector.shape_cast %160 : vector<64xf32> to vector<64x1xf32>
    %162 = tpu.reciprocal %161 {approx = true} : vector<64x1xf32> -> vector<64x1xf32>
    %163 = vector.broadcast %162 : vector<64x1xf32> to vector<64x16xf32>
    %164 = arith.mulf %159, %163 : vector<64x16xf32>
    %165 = arith.truncf %164 : vector<64x16xf32> to vector<64x16xbf16>
    %166 = vector.extract_strided_slice %138 {offsets = [0, 64], sizes = [16, 8], strides = [1, 1]} : vector<16x96xbf16> to vector<16x8xbf16>
    %167 = vector.extract_strided_slice %165 {offsets = [0, 0], sizes = [16, 16], strides = [1, 1]} : vector<64x16xbf16> to vector<16x16xbf16>
    %cst_42 = arith.constant dense<0.000000e+00> : vector<16x8xf32>
    %168 = tpu.matmul %167, %166, %cst_42 {dimension_numbers = #tpu.dot_dimension_numbers<[1], [0], [0], [1], [0, 0, 1, 1], [], []>} : vector<16x16xbf16>, vector<16x8xbf16>, vector<16x8xf32> -> vector<16x8xf32>
    %169 = vector.extract_strided_slice %138 {offsets = [0, 72], sizes = [16, 8], strides = [1, 1]} : vector<16x96xbf16> to vector<16x8xbf16>
    %170 = vector.extract_strided_slice %165 {offsets = [16, 0], sizes = [16, 16], strides = [1, 1]} : vector<64x16xbf16> to vector<16x16xbf16>
    %cst_43 = arith.constant dense<0.000000e+00> : vector<16x8xf32>
    %171 = tpu.matmul %170, %169, %cst_43 {dimension_numbers = #tpu.dot_dimension_numbers<[1], [0], [0], [1], [0, 0, 1, 1], [], []>} : vector<16x16xbf16>, vector<16x8xbf16>, vector<16x8xf32> -> vector<16x8xf32>
    %172 = vector.extract_strided_slice %138 {offsets = [0, 80], sizes = [16, 8], strides = [1, 1]} : vector<16x96xbf16> to vector<16x8xbf16>
    %173 = vector.extract_strided_slice %165 {offsets = [32, 0], sizes = [16, 16], strides = [1, 1]} : vector<64x16xbf16> to vector<16x16xbf16>
    %cst_44 = arith.constant dense<0.000000e+00> : vector<16x8xf32>
    %174 = tpu.matmul %173, %172, %cst_44 {dimension_numbers = #tpu.dot_dimension_numbers<[1], [0], [0], [1], [0, 0, 1, 1], [], []>} : vector<16x16xbf16>, vector<16x8xbf16>, vector<16x8xf32> -> vector<16x8xf32>
    %175 = vector.extract_strided_slice %138 {offsets = [0, 88], sizes = [16, 8], strides = [1, 1]} : vector<16x96xbf16> to vector<16x8xbf16>
    %176 = vector.extract_strided_slice %165 {offsets = [48, 0], sizes = [16, 16], strides = [1, 1]} : vector<64x16xbf16> to vector<16x16xbf16>
    %cst_45 = arith.constant dense<0.000000e+00> : vector<16x8xf32>
    %177 = tpu.matmul %176, %175, %cst_45 {dimension_numbers = #tpu.dot_dimension_numbers<[1], [0], [0], [1], [0, 0, 1, 1], [], []>} : vector<16x16xbf16>, vector<16x8xbf16>, vector<16x8xf32> -> vector<16x8xf32>
    %178 = tpu.concatenate %168, %171, %174, %177 in 1 : vector<16x8xf32>, vector<16x8xf32>, vector<16x8xf32>, vector<16x8xf32> -> vector<16x32xf32>
    %179 = arith.truncf %178 : vector<16x32xf32> to vector<16x32xbf16>
    %cst_46 = arith.constant dense<0.000000e+00> : vector<16x32xf32>
    %180 = tpu.matmul %179, %123, %cst_46 {dimension_numbers = #tpu.dot_dimension_numbers<[1], [0], [0], [1], [0, 0, 1, 1], [], []>} : vector<16x32xbf16>, vector<32x32xbf16>, vector<16x32xf32> -> vector<16x32xf32>
    %181 = vector.broadcast %127 : vector<1x32xf32> to vector<16x32xf32>
    %182 = arith.addf %180, %181 : vector<16x32xf32>
    %183 = arith.addf %121, %182 : vector<16x32xf32>
    %cst_47 = arith.constant dense<0.000000e+00> : vector<16xf32>
    %184 = vector.multi_reduction <add>, %183, %cst_47 [1] : vector<16x32xf32> to vector<16xf32>
    %185 = vector.shape_cast %184 : vector<16xf32> to vector<16x1xf32>
    %cst_48 = arith.constant 3.200000e+01 : f32
    %186 = vector.broadcast %cst_48 : f32 to vector<16x1xf32>
    %187 = arith.divf %185, %186 : vector<16x1xf32>
    %188 = vector.broadcast %187 : vector<16x1xf32> to vector<16x32xf32>
    %189 = arith.subf %183, %188 : vector<16x32xf32>
    %190 = arith.mulf %189, %189 : vector<16x32xf32>
    %cst_49 = arith.constant dense<0.000000e+00> : vector<16xf32>
    %191 = vector.multi_reduction <add>, %190, %cst_49 [1] : vector<16x32xf32> to vector<16xf32>
    %192 = vector.shape_cast %191 : vector<16xf32> to vector<16x1xf32>
    %cst_50 = arith.constant 3.200000e+01 : f32
    %193 = vector.broadcast %cst_50 : f32 to vector<16x1xf32>
    %194 = arith.divf %192, %193 : vector<16x1xf32>
    %cst_51 = arith.constant 9.99999974E-6 : f32
    %195 = vector.broadcast %cst_51 : f32 to vector<16x1xf32>
    %196 = arith.addf %194, %195 : vector<16x1xf32>
    %197 = math.rsqrt %196 : vector<16x1xf32>
    %198 = vector.broadcast %187 : vector<16x1xf32> to vector<16x32xf32>
    %199 = arith.subf %183, %198 : vector<16x32xf32>
    %200 = vector.broadcast %197 : vector<16x1xf32> to vector<16x32xf32>
    %201 = arith.mulf %199, %200 : vector<16x32xf32>
    %202 = vector.broadcast %128 : vector<1x32xf32> to vector<16x32xf32>
    %203 = arith.mulf %201, %202 : vector<16x32xf32>
    %204 = vector.broadcast %129 : vector<1x32xf32> to vector<16x32xf32>
    %205 = arith.addf %203, %204 : vector<16x32xf32>
    %206 = arith.truncf %205 : vector<16x32xf32> to vector<16x32xbf16>
    %cst_52 = arith.constant dense<0.000000e+00> : vector<16x64xf32>
    %207 = tpu.matmul %206, %124, %cst_52 {dimension_numbers = #tpu.dot_dimension_numbers<[1], [0], [0], [1], [0, 0, 1, 1], [], []>} : vector<16x32xbf16>, vector<32x64xbf16>, vector<16x64xf32> -> vector<16x64xf32>
    %208 = vector.broadcast %130 : vector<1x64xf32> to vector<16x64xf32>
    %209 = arith.addf %207, %208 : vector<16x64xf32>
    %cst_53 = arith.constant 0.000000e+00 : f32
    %210 = vector.broadcast %cst_53 : f32 to vector<16x64xf32>
    %211 = arith.maximumf %209, %210 : vector<16x64xf32>
    %212 = arith.truncf %211 : vector<16x64xf32> to vector<16x64xbf16>
    %cst_54 = arith.constant dense<0.000000e+00> : vector<16x32xf32>
    %213 = tpu.matmul %212, %125, %cst_54 {dimension_numbers = #tpu.dot_dimension_numbers<[1], [0], [0], [1], [0, 0, 1, 1], [], []>} : vector<16x64xbf16>, vector<64x32xbf16>, vector<16x32xf32> -> vector<16x32xf32>
    %214 = vector.broadcast %131 : vector<1x32xf32> to vector<16x32xf32>
    %215 = arith.addf %213, %214 : vector<16x32xf32>
    %216 = arith.addf %205, %215 : vector<16x32xf32>
    %cst_55 = arith.constant dense<0.000000e+00> : vector<16xf32>
    %217 = vector.multi_reduction <add>, %216, %cst_55 [1] : vector<16x32xf32> to vector<16xf32>
    %218 = vector.shape_cast %217 : vector<16xf32> to vector<16x1xf32>
    %cst_56 = arith.constant 3.200000e+01 : f32
    %219 = vector.broadcast %cst_56 : f32 to vector<16x1xf32>
    %220 = arith.divf %218, %219 : vector<16x1xf32>
    %221 = vector.broadcast %220 : vector<16x1xf32> to vector<16x32xf32>
    %222 = arith.subf %216, %221 : vector<16x32xf32>
    %223 = arith.mulf %222, %222 : vector<16x32xf32>
    %cst_57 = arith.constant dense<0.000000e+00> : vector<16xf32>
    %224 = vector.multi_reduction <add>, %223, %cst_57 [1] : vector<16x32xf32> to vector<16xf32>
    %225 = vector.shape_cast %224 : vector<16xf32> to vector<16x1xf32>
    %cst_58 = arith.constant 3.200000e+01 : f32
    %226 = vector.broadcast %cst_58 : f32 to vector<16x1xf32>
    %227 = arith.divf %225, %226 : vector<16x1xf32>
    %cst_59 = arith.constant 9.99999974E-6 : f32
    %228 = vector.broadcast %cst_59 : f32 to vector<16x1xf32>
    %229 = arith.addf %227, %228 : vector<16x1xf32>
    %230 = math.rsqrt %229 : vector<16x1xf32>
    %231 = vector.broadcast %220 : vector<16x1xf32> to vector<16x32xf32>
    %232 = arith.subf %216, %231 : vector<16x32xf32>
    %233 = vector.broadcast %230 : vector<16x1xf32> to vector<16x32xf32>
    %234 = arith.mulf %232, %233 : vector<16x32xf32>
    %235 = vector.broadcast %132 : vector<1x32xf32> to vector<16x32xf32>
    %236 = arith.mulf %234, %235 : vector<16x32xf32>
    %237 = vector.broadcast %133 : vector<1x32xf32> to vector<16x32xf32>
    %238 = arith.addf %236, %237 : vector<16x32xf32>
    %239 = vector.extract_strided_slice %4 {offsets = [16, 0], sizes = [1, 32], strides = [1, 1]} : vector<18x128xf32> to vector<1x32xf32>
    %240 = vector.extract_strided_slice %4 {offsets = [17, 0], sizes = [1, 32], strides = [1, 1]} : vector<18x128xf32> to vector<1x32xf32>
    %cst_60 = arith.constant dense<0.000000e+00> : vector<16xf32>
    %241 = vector.multi_reduction <add>, %238, %cst_60 [1] : vector<16x32xf32> to vector<16xf32>
    %242 = vector.shape_cast %241 : vector<16xf32> to vector<16x1xf32>
    %cst_61 = arith.constant 3.200000e+01 : f32
    %243 = vector.broadcast %cst_61 : f32 to vector<16x1xf32>
    %244 = arith.divf %242, %243 : vector<16x1xf32>
    %245 = vector.broadcast %244 : vector<16x1xf32> to vector<16x32xf32>
    %246 = arith.subf %238, %245 : vector<16x32xf32>
    %247 = arith.mulf %246, %246 : vector<16x32xf32>
    %cst_62 = arith.constant dense<0.000000e+00> : vector<16xf32>
    %248 = vector.multi_reduction <add>, %247, %cst_62 [1] : vector<16x32xf32> to vector<16xf32>
    %249 = vector.shape_cast %248 : vector<16xf32> to vector<16x1xf32>
    %cst_63 = arith.constant 3.200000e+01 : f32
    %250 = vector.broadcast %cst_63 : f32 to vector<16x1xf32>
    %251 = arith.divf %249, %250 : vector<16x1xf32>
    %cst_64 = arith.constant 9.99999974E-6 : f32
    %252 = vector.broadcast %cst_64 : f32 to vector<16x1xf32>
    %253 = arith.addf %251, %252 : vector<16x1xf32>
    %254 = math.rsqrt %253 : vector<16x1xf32>
    %255 = vector.broadcast %244 : vector<16x1xf32> to vector<16x32xf32>
    %256 = arith.subf %238, %255 : vector<16x32xf32>
    %257 = vector.broadcast %254 : vector<16x1xf32> to vector<16x32xf32>
    %258 = arith.mulf %256, %257 : vector<16x32xf32>
    %259 = vector.broadcast %239 : vector<1x32xf32> to vector<16x32xf32>
    %260 = arith.mulf %258, %259 : vector<16x32xf32>
    %261 = vector.broadcast %240 : vector<1x32xf32> to vector<16x32xf32>
    %262 = arith.addf %260, %261 : vector<16x32xf32>
    %c0_65 = arith.constant 0 : index
    %c0_66 = arith.constant 0 : index
    %263 = vector.load %arg6[%c0_65, %c0_66] : memref<16x32xf32, #tpu.memory_space<vmem>>, vector<16x32xf32>
    tpu.vector_store %arg6[%c0_65, %c0_66], %262 {strides = array<i32>} : memref<16x32xf32, #tpu.memory_space<vmem>>, vector<16x32xf32>,
    return
  }
  func.func @transform_0(%arg0: i32) -> (i32, i32) {
    %c0_i32 = arith.constant 0 : i32
    %c0_i32_0 = arith.constant 0 : i32
    %c0_i32_1 = arith.constant 0 : i32
    return %c0_i32, %c0_i32_0 : i32, i32
  }
  func.func @transform_1(%arg0: i32) -> (i32, i32) {
    %c0_i32 = arith.constant 0 : i32
    %c0_i32_0 = arith.constant 0 : i32
    %c0_i32_1 = arith.constant 0 : i32
    return %c0_i32, %c0_i32_0 : i32, i32
  }
  func.func @transform_2(%arg0: i32) -> (i32, i32) {
    %c0_i32 = arith.constant 0 : i32
    %c0_i32_0 = arith.constant 0 : i32
    %c0_i32_1 = arith.constant 0 : i32
    return %c0_i32, %c0_i32_0 : i32, i32
  }
  func.func @transform_3(%arg0: i32) -> (i32, i32) {
    %c0_i32 = arith.constant 0 : i32
    %c0_i32_0 = arith.constant 0 : i32
    %c0_i32_1 = arith.constant 0 : i32
    return %c0_i32, %c0_i32_0 : i32, i32
  }
  func.func @transform_4(%arg0: i32) -> (i32, i32) {
    %c0_i32 = arith.constant 0 : i32
    %c0_i32_0 = arith.constant 0 : i32
    %c0_i32_1 = arith.constant 0 : i32
    return %c0_i32, %c0_i32_0 : i32, i32
  }
  func.func @transform_5(%arg0: i32) -> (i32, i32) {
    %c0_i32 = arith.constant 0 : i32
    %c0_i32_0 = arith.constant 0 : i32
    %c0_i32_1 = arith.constant 0 : i32
    return %c0_i32, %c0_i32_0 : i32, i32
  }
}

</mosaic_0001>

<bundles_post_ra>
// kernel: transformer_encoder.1
= control target key start
LH: loop header
LB: loop body
LE: loop exit
PB: predicated region body
PF: predicated region fallthrough
CT: control target
= control target key end

     0   :  { %v2253_v1 = vmov 0.0   ;;  %vm2254_vm0 = vmmov 0   ;;  %vm68_vm1 = vcmask 261120   ;;  %s2796_s0 = inlined_call_operand.vmem [shape: f32[16,32], index: 0, kind: input, shape index: {}]   ;;  %s2797_s1 = inlined_call_operand.vmem [shape: f32[64,16], index: 1, kind: input, shape index: {}]   ;;  %s2798_s2 = inlined_call_operand.vmem [shape: bf16[32,384], index: 2, kind: input, shape index: {}]   ;;  %s2799_s3 = inlined_call_operand.vmem [shape: bf16[64,64], index: 3, kind: input, shape index: {}]   ;;  %s2800_s4 = inlined_call_operand.vmem [shape: f32[18,128], index: 4, kind: input, shape index: {}]   ;;  %s2801_s5 = inlined_call_operand.hbm [shape: f32[16,32], index: 5, kind: output, shape index: {}]  }
   0x1   :  { %v2305_v0 = vld [vmem:[%s2798_s2] ss:$12 sps:$4 sm:$0xff]   ;;  %1916 = vmatprep.subr.bf16.mxu1 %v2253_v1  ;;  %1920 = vmatprep.mubr.msk.bf16.mxu1 %vm2254_vm0, %v2253_v1  ;;  %v2314_v2 = vld [vmem:[%s2798_s2 + $0x18] ss:$12 sps:$4 sm:$0xff]  }
   0x2   :  { %1917 = vmatpush3.bf16.msra.mxu1 %v2305_v0  ;;  %v2319_v3 = vld [vmem:[%s2796_s0] sm:$0xff]  ;;  %1930 = vmatprep.subr.bf16.mxu0 %v2253_v1  ;;  %v2326_v4 = vld [vmem:[%s2796_s0 + $0x8] sm:$0xff] }
   0x3   :  { %1918 = vmatprep.subr.bf16.mxu1 %v2253_v1  ;;  %1932 = vmatprep.mubr.msk.bf16.mxu0 %vm2254_vm0, %v2253_v1  ;;  %v51_v5 = vpack.c.bf16 %v2326_v4, %v2319_v3 }
   0x6   :  { %1919 = vmatpush3.bf16.msra.mxu1 %v2314_v2 }
   0x7   :  { %1924 = vmatprep.subr.bf16.mxu1 %v2253_v1 }
   0x8   :  { %10 = vsyncpa [#allocation3], 0  ;;  %v52_v6 = vlaneseq  ;;  %v2345_v9 = vld [vmem:[%s2800_s4] sm:$0xff]  ;;  %s2255_s27 = smov 80   ;;  %s2256_s28 = smov 96   ;;  %vm117_vm2 = vcmask 64512  }
   0x9   :  { %1921 = vmatmul.mubr.msk.bf16.vlgmr.msra.gmra.mrb[0].mxu1 %vm68_vm1, %v51_v5  ;;  %s2257_s29 = smov 120   ;;  %s2258_s30 = smov 88   ;;  %v2389_v30 = vld [vmem:[%s2797_s1] sm:$0xff]  ;;  %vm334_vm3 = vcmask 130048   ;;  %v2394_v34 = vld [vmem:[%s2797_s1 + $0x8] sm:$0xff]  ;;  %v2400_v39 = vld [vmem:[%s2797_s1 + $0x10] sm:$0xff] }
   0xa   :  { %1926 = vmatprep.mubr.msk.bf16.mxu1 %vm2254_vm0, %v2253_v1  ;;  %v2337_v7 = vshrl.u32 %v52_v6, 7  ;;  %s2259_s6 = smov 112   ;;  %s2260_s7 = smov 72   ;;  %v2407_v45 = vld [vmem:[%s2797_s1 + $0x18] sm:$0xff]  ;;  %v2414_v51 = vld [vmem:[%s2797_s1 + $0x20] sm:$0xff]  ;;  %v2420_v56 = vld [vmem:[%s2797_s1 + $0x28] sm:$0xff] }
   0xb   :  { %s2261_s8 = smov 104   ;;  %v2428_v63 = vld [vmem:[%s2797_s1 + $0x30] sm:$0xff]  ;;  %s2263_s25 = smov 64   ;;  %vm643_vm4 = vcmask 195584   ;;  %vm830_vm5 = vcmask 523264  }
   0xc   :  { %v2340_v8 = vsub.s32 0, %v2337_v7  ;;  %s2264_s0 = smov 48   ;;  %s2265_s26 = smov 40  }
   0xd   :  { %s2266_s13 = smov 32   ;;  %s2267_s14 = smov 8  }
   0xe   :  { %v55_v10 = vrot.slane %v2345_v9, %v2340_v8  ;;  %s2268_s15 = smov 16   ;;  %s2269_s16 = smov 24  }
  0xdc   :  { %v106_v11 = vpop.f32.mrb[0].mxu1 }
  0xdd   :  { %v1922_v12 = vpop.f32.mrb[1].mxu1  ;;  %v107_v14 = vadd.f32 %v106_v11, %v55_v10 }
  0xde   :  { %v109_v13 = vpop.f32.mrb[2].mxu1  ;;  %v2434_v12 = vld [vmem:[%s2797_s1 + $0x38] sm:$0xff]  ;;  %s2262_s1 = smov 56  }
  0xdf   :  { %v110_v15 = vadd.f32 %v109_v13, %v55_v10  ;;  %v1923_v16 = vpop.f32.mrb[3].mxu1 }
  0xe1   :  { %v2349_v17 = vpack.c.bf16 %v110_v15, %v107_v14 }
  0xe3   :  { %218 = vrot.lane.b32.xlu1 %v2349_v17, %s2255_s27  ;;  %115 = vrot.lane.b32.xlu0 %v2349_v17, %s2256_s28 }
  0xe7   :  { %165 = vrot.lane.b32.xlu1 %v2349_v17, %s2257_s29  ;;  %167 = vrot.lane.b32.xlu0 %v2349_v17, %s2258_s30 }
  0xeb   :  { %216 = vrot.lane.b32.xlu1 %v2349_v17, %s2259_s6  ;;  %269 = vrot.lane.b32.xlu0 %v2349_v17, %s2260_s7 }
  0xef   :  { %267 = vrot.lane.b32.xlu0 %v2349_v17, %s2261_s8 }
 0x155   :  { %v116_v18 = vpop.permute.xlu0 %115  ;;  %v219_v20 = vpop.permute.xlu1 %218 }
 0x156   :  { %v122_v19 = vsel %vm117_vm2, %v116_v18, 0  ;;  %v224_v23 = vsel %vm117_vm2, %v219_v20, 0 }
 0x157   :  { %1925 = vmatpush3.bf16.xpose.msra.mxu1 %v122_v19 }
 0x158   :  { %1936 = vmatprep.subr.bf16.mxu1 %v2253_v1 }
 0x159   :  { %v168_v21 = vpop.permute.xlu0 %167  ;;  %v166_v24 = vpop.permute.xlu1 %165 }
 0x15a   :  { %v173_v22 = vsel %vm117_vm2, %v168_v21, 0 }
 0x15b   :  { %1931 = vmatpush3.bf16.xpose.msra.mxu0 %v173_v22 }
 0x15c   :  { %1942 = vmatprep.subr.bf16.mxu0 %v2253_v1 }
 0x15d   :  { %v270_v25 = vpop.permute.xlu0 %269  ;;  %v217_v27 = vpop.permute.xlu1 %216 }
 0x15e   :  { %1927 = vmatmul.mubr.msk.bf16.vlgmr.msra.gmra.mrb[4].mxu1 %vm117_vm2, %v2349_v17  ;;  %v275_v26 = vsel %vm117_vm2, %v270_v25, 0 }
 0x15f   :  { %1937 = vmatpush3.bf16.xpose.msra.mxu1 %v224_v23  ;;  %1938 = vmatprep.mubr.msk.bf16.mxu1 %vm2254_vm0, %v2253_v1 }
 0x160   :  { %1948 = vmatprep.subr.bf16.mxu1 %v2253_v1 }
 0x161   :  { %v268_v28 = vpop.permute.xlu0 %267 }
 0x162   :  { %1933 = vmatmul.mubr.msk.bf16.vlgmr.msra.gmra.mrb[0].mxu0 %vm117_vm2, %v166_v24 }
 0x163   :  { %1943 = vmatpush3.bf16.xpose.msra.mxu0 %v275_v26  ;;  %1944 = vmatprep.mubr.msk.bf16.mxu0 %vm2254_vm0, %v2253_v1 }
 0x164   :  { %1954 = vmatprep.subr.bf16.mxu0 %v2253_v1 }
 0x166   :  { %1939 = vmatmul.mubr.msk.bf16.vlgmr.msra.gmra.mrb[8].mxu1 %vm117_vm2, %v217_v27 }
 0x167   :  { %1950 = vmatprep.mubr.msk.bf16.mxu1 %vm2254_vm0, %v2253_v1 }
 0x16a   :  { %1945 = vmatmul.mubr.msk.bf16.vlgmr.msra.gmra.mrb[4].mxu0 %vm117_vm2, %v268_v28 }
 0x16b   :  { %1956 = vmatprep.mubr.msk.bf16.mxu0 %vm2254_vm0, %v2253_v1 }
 0x231   :  { %v158_v29 = vpop.f32.mrb[4].mxu1 }
 0x232   :  { %v318_v31 = vmul.f32 0.35355338, %v158_v29  ;;  %v1928_v32 = vpop.f32.mrb[5].mxu1 }
 0x233   :  { %v161_v33 = vpop.f32.mrb[6].mxu1 }
 0x234   :  { %v319_v35 = vmul.f32 0.35355338, %v161_v33  ;;  %v1929_v36 = vpop.f32.mrb[7].mxu1  ;;  %v326_v37 = vadd.f32 %v318_v31, %v2389_v30 }
 0x235   :  { %v209_v38 = vpop.f32.mrb[0].mxu0 }
 0x236   :  { %v320_v40 = vmul.f32 0.35355338, %v209_v38  ;;  %v1934_v41 = vpop.f32.mrb[1].mxu0  ;;  %v335_v42 = vsel %vm334_vm3, %v326_v37, -inf  ;;  %v327_v43 = vadd.f32 %v319_v35, %v2394_v34 }
 0x237   :  { %v212_v44 = vpop.f32.mrb[2].mxu0  ;;  %336 = vmax.xlane.f32.xlu1 %v335_v42 }
 0x238   :  { %v321_v46 = vmul.f32 0.35355338, %v212_v44  ;;  %v1935_v47 = vpop.f32.mrb[3].mxu0  ;;  %v338_v48 = vsel %vm334_vm3, %v327_v43, -inf  ;;  %v328_v49 = vadd.f32 %v320_v40, %v2400_v39 }
 0x239   :  { %339 = vmax.xlane.f32.xlu0 %v338_v48  ;;  %v260_v50 = vpop.f32.mrb[8].mxu1 }
 0x23a   :  { %v322_v52 = vmul.f32 0.35355338, %v260_v50  ;;  %v1940_v53 = vpop.f32.mrb[9].mxu1  ;;  %v329_v54 = vadd.f32 %v321_v46, %v2407_v45  ;;  %v341_v60 = vsel %vm334_vm3, %v328_v49, -inf }
 0x23b   :  { %v263_v55 = vpop.f32.mrb[10].mxu1 }
 0x23c   :  { %v323_v57 = vmul.f32 0.35355338, %v263_v55  ;;  %v1941_v58 = vpop.f32.mrb[11].mxu1  ;;  %v344_v59 = vsel %vm334_vm3, %v329_v54, -inf  ;;  %v330_v61 = vadd.f32 %v322_v52, %v2414_v51 }
 0x23d   :  { %v311_v62 = vpop.f32.mrb[4].mxu0  ;;  %345 = vmax.xlane.f32.xlu1 %v344_v59  ;;  %342 = vmax.xlane.f32.xlu0 %v341_v60 }
 0x23e   :  { %v324_v5 = vmul.f32 0.35355338, %v311_v62  ;;  %v1946_v6 = vpop.f32.mrb[5].mxu0  ;;  %v331_v10 = vadd.f32 %v323_v57, %v2420_v56  ;;  %v347_v15 = vsel %vm334_vm3, %v330_v61, -inf }
 0x23f   :  { %v314_v11 = vpop.f32.mrb[6].mxu0 }
 0x240   :  { %v325_v13 = vmul.f32 0.35355338, %v314_v11  ;;  %v1947_v14 = vpop.f32.mrb[7].mxu0  ;;  %v350_v16 = vsel %vm334_vm3, %v331_v10, -inf  ;;  %v332_v18 = vadd.f32 %v324_v5, %v2428_v63 }
 0x241   :  { %348 = vmax.xlane.f32.xlu0 %v347_v15  ;;  %351 = vmax.xlane.f32.xlu1 %v350_v16 }
 0x242   :  { %v333_v19 = vadd.f32 %v325_v13, %v2434_v12  ;;  %v353_v20 = vsel %vm334_vm3, %v332_v18, -inf }
 0x244   :  { %v356_v21 = vsel %vm334_vm3, %v333_v19, -inf }
 0x245   :  { %354 = vmax.xlane.f32.xlu0 %v353_v20  ;;  %357 = vmax.xlane.f32.xlu1 %v356_v21 }
 0x256   :  { %474 = vrot.lane.b32.xlu1 %v2349_v17, %s2262_s1 }
 0x25b   :  { %427 = vrot.lane.b32.xlu0 %v2349_v17, %s2263_s25 }
 0x2c4   :  { %v337_v22 = vpop.xlane.xlu1 %336 }
 0x2c5   :  { %v359_v23 = vsub.f32 %v326_v37, %v337_v22 }
 0x2c6   :  { %v340_v24 = vpop.xlane.xlu0 %339 }
 0x2c7   :  { %v367_v25 = vmul.f32 1.442695, %v359_v23  ;;  %v360_v26 = vsub.f32 %v327_v43, %v340_v24 }
 0x2c9   :  { %2145 = vpow2.f32 %v367_v25  ;;  %v369_v27 = vmul.f32 1.442695, %v360_v26 }
 0x2ca   :  { %v346_v28 = vpop.xlane.xlu1 %345  ;;  %v343_v29 = vpop.xlane.xlu0 %342 }
 0x2cb   :  { %2147 = vpow2.f32 %v369_v27  ;;  %v362_v31 = vsub.f32 %v329_v54, %v346_v28  ;;  %v361_v32 = vsub.f32 %v328_v49, %v343_v29 }
 0x2cd   :  { %v373_v33 = vmul.f32 1.442695, %v362_v31  ;;  %v371_v35 = vmul.f32 1.442695, %v361_v32 }
 0x2ce   :  { %v349_v36 = vpop.xlane.xlu0 %348  ;;  %v352_v38 = vpop.xlane.xlu1 %351 }
 0x2cf   :  { %2149 = vpow2.f32 %v373_v33  ;;  %v363_v40 = vsub.f32 %v330_v61, %v349_v36  ;;  %v364_v41 = vsub.f32 %v331_v10, %v352_v38 }
 0x2d0   :  { %2151 = vpow2.f32 %v371_v35 }
 0x2d1   :  { %v375_v42 = vmul.f32 1.442695, %v363_v40  ;;  %v377_v37 = vmul.f32 1.442695, %v364_v41 }
 0x2d2   :  { %v355_v44 = vpop.xlane.xlu0 %354  ;;  %v358_v46 = vpop.xlane.xlu1 %357 }
 0x2d3   :  { %v2146_v43 = vpop.eup %2145  ;;  %2153 = vpow2.f32 %v375_v42  ;;  %v365_v47 = vsub.f32 %v332_v18, %v355_v44  ;;  %v366_v48 = vsub.f32 %v333_v19, %v358_v46 }
 0x2d4   :  { %2155 = vpow2.f32 %v377_v37  ;;  %v383_v50 = vsel %vm334_vm3, %v2146_v43, 0.0 }
 0x2d5   :  { %v2148_v49 = vpop.eup %2147  ;;  %v379_v52 = vmul.f32 1.442695, %v365_v47  ;;  %v381_v53 = vmul.f32 1.442695, %v366_v48  ;;  %384 = vadd.xlane.f32.xlu0 %v383_v50  ;;  %v2472_v50 = vld [vmem:[%s2798_s2 + $0x4] ss:$12 sps:$4 sm:$0xff]  }
 0x2d6   :  { %v428_v54 = vpop.permute.xlu0 %427  ;;  %v475_v55 = vpop.permute.xlu1 %474  ;;  %v386_v57 = vsel %vm334_vm3, %v2148_v49, 0.0 }
 0x2d7   :  { %2157 = vpow2.f32 %v379_v52  ;;  %1949 = vmatpush3.bf16.msra.mxu1 %v428_v54  ;;  %387 = vadd.xlane.f32.xlu1 %v386_v57  ;;  %v2480_v52 = vld [vmem:[%s2798_s2 + $0x1c] ss:$12 sps:$4 sm:$0xff]  }
 0x2d8   :  { %2159 = vpow2.f32 %v381_v53  ;;  %1955 = vmatpush3.bf16.msra.mxu0 %v475_v55  ;;  %1960 = vmatprep.subr.bf16.mxu1 %v2253_v1 }
 0x2d9   :  { %v2150_v58 = vpop.eup %2149  ;;  %1966 = vmatprep.subr.bf16.mxu0 %v2253_v1 }
 0x2da   :  { %v2152_v59 = vpop.eup %2151  ;;  %v392_v60 = vsel %vm334_vm3, %v2150_v58, 0.0 }
 0x2db   :  { %v389_v61 = vsel %vm334_vm3, %v2152_v59, 0.0  ;;  %393 = vadd.xlane.f32.xlu1 %v392_v60 }
 0x2dc   :  { %390 = vadd.xlane.f32.xlu0 %v389_v61 }
 0x2dd   :  { %v2154_v62 = vpop.eup %2153 }
 0x2de   :  { %v2156_v5 = vpop.eup %2155  ;;  %v395_v6 = vsel %vm334_vm3, %v2154_v62, 0.0 }
 0x2df   :  { %v398_v10 = vsel %vm334_vm3, %v2156_v5, 0.0 }
 0x2e0   :  { %396 = vadd.xlane.f32.xlu0 %v395_v6  ;;  %399 = vadd.xlane.f32.xlu1 %v398_v10 }
 0x2e1   :  { %v2158_v11 = vpop.eup %2157 }
 0x2e2   :  { %v2160_v13 = vpop.eup %2159  ;;  %v401_v14 = vsel %vm334_vm3, %v2158_v11, 0.0 }
 0x2e3   :  { %v404_v15 = vsel %vm334_vm3, %v2160_v13, 0.0 }
 0x2e4   :  { %402 = vadd.xlane.f32.xlu0 %v401_v14  ;;  %405 = vadd.xlane.f32.xlu1 %v404_v15 }
 0x2f5   :  { %521 = vrot.lane.b32.xlu1 %v2349_v17, %s2264_s0 }
 0x2f9   :  { %651 = vrot.lane.b32.xlu1 %v2305_v0, %s2266_s13 }
 0x2fa   :  { %568 = vrot.lane.b32.xlu0 %v2349_v17, %s2265_s26 }
 0x362   :  { %v385_v16 = vpop.xlane.xlu0 %384 }
 0x363   :  { %2161 = vrcp.f32 %v385_v16 }
 0x364   :  { %v388_v18 = vpop.xlane.xlu1 %387 }
 0x365   :  { %2163 = vrcp.f32 %v388_v18 }
 0x368   :  { %v394_v19 = vpop.xlane.xlu1 %393 }
 0x369   :  { %v391_v20 = vpop.xlane.xlu0 %390  ;;  %2165 = vrcp.f32 %v394_v19 }
 0x36a   :  { %2167 = vrcp.f32 %v391_v20 }
 0x36d   :  { %v2162_v21 = vpop.eup %2161  ;;  %v397_v22 = vpop.xlane.xlu0 %396 }
 0x36e   :  { %v400_v23 = vpop.xlane.xlu1 %399  ;;  %2169 = vrcp.f32 %v397_v22  ;;  %v415_v25 = vmul.f32 %v2162_v21, %v2146_v43 }
 0x36f   :  { %v2164_v24 = vpop.eup %2163  ;;  %2171 = vrcp.f32 %v400_v23 }
 0x370   :  { %v416_v26 = vmul.f32 %v2164_v24, %v2148_v49 }
 0x371   :  { %v403_v27 = vpop.xlane.xlu0 %402 }
 0x372   :  { %v406_v28 = vpop.xlane.xlu1 %405  ;;  %2173 = vrcp.f32 %v403_v27  ;;  %v423_v17 = vpack.c.bf16 %v416_v26, %v415_v25 }
 0x373   :  { %v2166_v29 = vpop.eup %2165  ;;  %2175 = vrcp.f32 %v406_v28 }
 0x374   :  { %v2168_v31 = vpop.eup %2167  ;;  %v418_v32 = vmul.f32 %v2166_v29, %v2150_v58  ;;  %1951 = vmatmul.mubr.msk.bf16.vlgmr.msra.gmra.mrb[12].mxu1 %vm334_vm3, %v423_v17 }
 0x375   :  { %v417_v33 = vmul.f32 %v2168_v31, %v2152_v59  ;;  %1962 = vmatprep.mubr.msk.bf16.mxu1 %vm2254_vm0, %v2253_v1  ;;  %v569_v42 = vpop.permute.xlu0 %568 }
 0x376   :  { %v522_v35 = vpop.permute.xlu1 %521 }
 0x377   :  { %1961 = vmatpush3.bf16.msra.mxu1 %v522_v35  ;;  %v424_v36 = vpack.c.bf16 %v418_v32, %v417_v33 }
 0x378   :  { %1972 = vmatprep.subr.bf16.mxu1 %v2253_v1  ;;  %v2170_v38 = vpop.eup %2169 }
 0x379   :  { %v2172_v40 = vpop.eup %2171  ;;  %v419_v41 = vmul.f32 %v2170_v38, %v2154_v62  ;;  %1957 = vmatmul.mubr.msk.bf16.vlgmr.msra.gmra.mrb[8].mxu0 %vm334_vm3, %v424_v36  ;;  %v2507_v38 = vsub.s32 1, %v2337_v7 }
 0x37a   :  { %v420_v37 = vmul.f32 %v2172_v40, %v2156_v5  ;;  %1967 = vmatpush3.bf16.msra.mxu0 %v569_v42  ;;  %1968 = vmatprep.mubr.msk.bf16.mxu0 %vm2254_vm0, %v2253_v1  ;;  %v652_v53 = vpop.permute.xlu1 %651 }
 0x37b   :  { %1980 = vmatprep.subr.bf16.mxu0 %v2253_v1  ;;  %v650_v40 = vrot.slane %v2345_v9, %v2507_v38 }
 0x37c   :  { %v2174_v44 = vpop.eup %2173  ;;  %v425_v46 = vpack.c.bf16 %v420_v37, %v419_v41 }
 0x37d   :  { %v2176_v43 = vpop.eup %2175  ;;  %v421_v47 = vmul.f32 %v2174_v44, %v2158_v11 }
 0x37e   :  { %v422_v48 = vmul.f32 %v2176_v43, %v2160_v13  ;;  %1963 = vmatmul.mubr.msk.bf16.vlgmr.msra.gmra.mrb[16].mxu1 %vm334_vm3, %v425_v46 }
 0x37f   :  { %1976 = vmatprep.mubr.msk.bf16.mxu1 %vm2254_vm0, %v2253_v1  ;;  %1973 = vmatpush3.bf16.msra.mxu1 %v652_v53 }
 0x380   :  { %v426_v49 = vpack.c.bf16 %v422_v48, %v421_v47  ;;  %1974 = vmatprep.subr.bf16.mxu1 %v2253_v1 }
 0x382   :  { %1969 = vmatmul.mubr.msk.bf16.vlgmr.msra.gmra.mrb[12].mxu0 %vm334_vm3, %v426_v49 }
 0x383   :  { %1981 = vmatpush3.bf16.msra.mxu0 %v2472_v50  ;;  %1984 = vmatprep.mubr.msk.bf16.mxu0 %vm2254_vm0, %v2253_v1 }
 0x384   :  { %1982 = vmatprep.subr.bf16.mxu0 %v2253_v1 }
 0x387   :  { %1983 = vmatpush3.bf16.msra.mxu0 %v2480_v52 }
 0x388   :  { %2000 = vmatprep.subr.bf16.mxu0 %v2253_v1 }
 0x447   :  { %v467_v54 = vpop.f32.mrb[12].mxu1 }
 0x448   :  { %v1952_v55 = vpop.f32.mrb[13].mxu1 }
 0x449   :  { %v470_v57 = vpop.f32.mrb[14].mxu1 }
 0x44a   :  { %v1953_v58 = vpop.f32.mrb[15].mxu1 }
 0x44c   :  { %v514_v59 = vpop.f32.mrb[8].mxu0 }
 0x44d   :  { %v1958_v60 = vpop.f32.mrb[9].mxu0 }
 0x44e   :  { %v517_v61 = vpop.f32.mrb[10].mxu0 }
 0x44f   :  { %v2103_v62 = vpack.i.bf16 %v517_v61, %v514_v59  ;;  %v1959_v5 = vpop.f32.mrb[11].mxu0 }
 0x451   :  { %v561_v6 = vpop.f32.mrb[16].mxu1  ;;  %2104 = vrot.lane.b32.xlu0 %v2103_v62, %s2267_s14 }
 0x452   :  { %v1964_v10 = vpop.f32.mrb[17].mxu1 }
 0x453   :  { %v564_v11 = vpop.f32.mrb[18].mxu1 }
 0x454   :  { %v2108_v0 = vpack.i.bf16 %v564_v11, %v561_v6  ;;  %v1965_v13 = vpop.f32.mrb[19].mxu1  ;;  %v2526_v6 = vld [vmem:[%s2799_s3 + $0x8] sm:$0xff]  }
 0x455   :  { %v608_v14 = vpop.f32.mrb[12].mxu0 }
 0x456   :  { %v1970_v15 = vpop.f32.mrb[13].mxu0  ;;  %2109 = vrot.lane.b32.xlu1 %v2108_v0, %s2268_s15 }
 0x457   :  { %v611_v16 = vpop.f32.mrb[14].mxu0 }
 0x458   :  { %v2113_v18 = vpack.i.bf16 %v611_v16, %v608_v14  ;;  %v1971_v19 = vpop.f32.mrb[15].mxu0  ;;  %v732_v16 = vsub.s32 2, %v2337_v7 }
 0x45a   :  { %2114 = vrot.lane.b32.xlu0 %v2113_v18, %s2269_s16  ;;  %653 = vrot.lane.b32.xlu1 %v2314_v2, %s2266_s13  ;;  %v733_v19 = vrot.slane %v2345_v9, %v732_v16 }
 0x4c3   :  { %v2105_v20 = vpop.permute.xlu0 %2104 }
 0x4c4   :  { %v2107_v22 = vunpack.i.h.bf16 %v2105_v20  ;;  %v2106_v23 = vunpack.i.l.bf16 %v2105_v20 }
 0x4c6   :  { %v639_v28 = vsel %vm117_vm2, %v467_v54, %v2106_v23  ;;  %v640_v17 = vsel %vm117_vm2, %v470_v57, %v2107_v22 }
 0x4c8   :  { %v2110_v21 = vpop.permute.xlu1 %2109 }
 0x4c9   :  { %v2112_v24 = vunpack.i.h.bf16 %v2110_v21  ;;  %v2111_v25 = vunpack.i.l.bf16 %v2110_v21  ;;  %v738_v21 = vsub.s32 3, %v2337_v7 }
 0x4cb   :  { %v642_v32 = vsel %vm334_vm3, %v640_v17, %v2112_v24  ;;  %v641_v2 = vsel %vm334_vm3, %v639_v28, %v2111_v25  ;;  %v739_v25 = vrot.slane %v2345_v9, %v738_v21 }
 0x4cc   :  { %v2115_v26 = vpop.permute.xlu0 %2114  ;;  %v654_v27 = vpop.permute.xlu1 %653 }
 0x4cd   :  { %v2117_v29 = vunpack.i.h.bf16 %v2115_v26  ;;  %v2116_v31 = vunpack.i.l.bf16 %v2115_v26  ;;  %1975 = vmatpush3.bf16.msra.mxu1 %v654_v27 }
 0x4ce   :  { %1988 = vmatprep.subr.bf16.mxu1 %v2253_v1 }
 0x4cf   :  { %v644_v33 = vsel %vm643_vm4, %v641_v2, %v2116_v31  ;;  %v645_v35 = vsel %vm643_vm4, %v642_v32, %v2117_v29  ;;  %v2545_v29 = vld [vmem:[%s2799_s3 + $0x10] sm:$0xff]   ;;  %v2552_v31 = vld [vmem:[%s2799_s3 + $0x18] sm:$0xff]   ;;  %v745_v32 = vsub.s32 4, %v2337_v7 }
 0x4d0   :  { %v646_v36 = vpack.c.bf16 %v645_v35, %v644_v33 }
 0x4d1   :  { %v746_v2 = vrot.slane %v2345_v9, %v745_v32 }
 0x4d2   :  { %1977 = vmatmul.mubr.msk.bf16.vlgmr.msra.gmra.mrb[20].mxu1 %vm68_vm1, %v646_v36 }
 0x4d3   :  { %1996 = vmatprep.mubr.msk.bf16.mxu1 %vm2254_vm0, %v2253_v1 }
 0x5a5   :  { %v694_v41 = vpop.f32.mrb[20].mxu1 }
 0x5a6   :  { %v695_v42 = vadd.f32 %v694_v41, %v650_v40  ;;  %v1978_v37 = vpop.f32.mrb[21].mxu1 }
 0x5a7   :  { %v697_v44 = vpop.f32.mrb[22].mxu1 }
 0x5a8   :  { %v698_v46 = vadd.f32 %v697_v44, %v650_v40  ;;  %v1979_v43 = vpop.f32.mrb[23].mxu1  ;;  %v701_v47 = vadd.f32 %v695_v42, %v2319_v3 }
 0x5a9   :  { %v804_v43 = vsub.s32 5, %v2337_v7 }
 0x5aa   :  { %v703_v48 = vsel %vm68_vm1, %v701_v47, 0.0  ;;  %v702_v49 = vadd.f32 %v698_v46, %v2326_v4  ;;  %v2520_v4 = vld [vmem:[%s2799_s3] sm:$0xff]  }
 0x5ab   :  { %704 = vadd.xlane.f32.xlu0 %v703_v48  ;;  %1989 = vmatpush3.bf16.msra.mxu1 %v2520_v4 }
 0x5ac   :  { %v706_v53 = vsel %vm68_vm1, %v702_v49, 0.0  ;;  %1990 = vmatprep.subr.bf16.mxu1 %v2253_v1 }
 0x5ad   :  { %707 = vadd.xlane.f32.xlu1 %v706_v53 }
 0x5af   :  { %1991 = vmatpush3.bf16.msra.mxu1 %v2526_v6 }
 0x5b0   :  { %1992 = vmatprep.subr.bf16.mxu1 %v2253_v1 }
 0x5b3   :  { %1993 = vmatpush3.bf16.msra.mxu1 %v2545_v29 }
 0x5b4   :  { %1994 = vmatprep.subr.bf16.mxu1 %v2253_v1 }
 0x5b7   :  { %1995 = vmatpush3.bf16.msra.mxu1 %v2552_v31 }
 0x5b8   :  { %2014 = vmatprep.subr.bf16.mxu1 %v2253_v1 }
 0x638   :  { %v705_v54 = vpop.xlane.xlu0 %704 }
 0x639   :  { %v710_v55 = vmul.f32 0.03125, %v705_v54 }
 0x63a   :  { %v708_v57 = vpop.xlane.xlu1 %707 }
 0x63b   :  { %v712_v58 = vsub.f32 %v701_v47, %v710_v55  ;;  %v711_v59 = vmul.f32 0.03125, %v708_v57  ;;  %v805_v47 = vrot.slane %v2345_v9, %v804_v43 }
 0x63d   :  { %v713_v60 = vsub.f32 %v702_v49, %v711_v59  ;;  %v714_v61 = vmul.f32 %v712_v58, %v712_v58 }
 0x63f   :  { %v716_v62 = vsel %vm68_vm1, %v714_v61, 0.0  ;;  %v715_v5 = vmul.f32 %v713_v60, %v713_v60 }
 0x640   :  { %717 = vadd.xlane.f32.xlu0 %v716_v62 }
 0x641   :  { %v719_v3 = vsel %vm68_vm1, %v715_v5, 0.0 }
 0x644   :  { %720 = vadd.xlane.f32.xlu0 %v719_v3 }
 0x6cd   :  { %v718_v10 = vpop.xlane.xlu0 %717 }
 0x6ce   :  { %v722_v11 = vmul.f32 0.03125, %v718_v10 }
 0x6d0   :  { %v724_v0 = vadd.f32 1e-05, %v722_v11 }
 0x6d1   :  { %v721_v13 = vpop.xlane.xlu0 %720 }
 0x6d2   :  { %2177 = vrsqrt.f32 %v724_v0  ;;  %v723_v14 = vmul.f32 0.03125, %v721_v13 }
 0x6d4   :  { %v725_v15 = vadd.f32 1e-05, %v723_v14 }
 0x6d6   :  { %2179 = vrsqrt.f32 %v725_v15 }
 0x6dc   :  { %v2178_v18 = vpop.eup %2177 }
 0x6dd   :  { %v728_v20 = vmul.f32 %v2178_v18, %v712_v58 }
 0x6df   :  { %v734_v23 = vmul.f32 %v733_v19, %v728_v20 }
 0x6e0   :  { %v2180_v22 = vpop.eup %2179 }
 0x6e1   :  { %v729_v24 = vmul.f32 %v2180_v22, %v713_v60  ;;  %v740_v27 = vadd.f32 %v739_v25, %v734_v23 }
 0x6e3   :  { %v735_v26 = vmul.f32 %v733_v19, %v729_v24  ;;  %v2583_v19 = vld [vmem:[%s2798_s2 + $0x8] ss:$12 sps:$4 sm:$0xff]  }
 0x6e5   :  { %v741_v28 = vadd.f32 %v739_v25, %v735_v26 }
 0x6e7   :  { %v742_v17 = vpack.c.bf16 %v741_v28, %v740_v27 }
 0x6e9   :  { %1985 = vmatmul.mubr.msk.bf16.vlgmr.msra.gmra.mrb[16].mxu0 %vm68_vm1, %v742_v17 }
 0x6ea   :  { %2004 = vmatprep.mubr.msk.bf16.mxu0 %vm2254_vm0, %v2253_v1 }
 0x7bc   :  { %v792_v33 = vpop.f32.mrb[16].mxu0 }
 0x7bd   :  { %v793_v35 = vadd.f32 %v792_v33, %v746_v2  ;;  %v1986_v36 = vpop.f32.mrb[17].mxu0 }
 0x7be   :  { %v795_v40 = vpop.f32.mrb[18].mxu0 }
 0x7bf   :  { %v796_v41 = vadd.f32 %v795_v40, %v746_v2  ;;  %v1987_v42 = vpop.f32.mrb[19].mxu0  ;;  %v799_v37 = vmax.f32 %v793_v35, 0.0  ;;  %v905_v35 = vsub.s32 6, %v2337_v7  ;;  %v911_v40 = vsub.s32 7, %v2337_v7 }
 0x7c1   :  { %v800_v44 = vmax.f32 %v796_v41, 0.0  ;;  %v906_v36 = vrot.slane %v2345_v9, %v905_v35 }
 0x7c3   :  { %v801_v46 = vpack.c.bf16 %v800_v44, %v799_v37 }
 0x7c5   :  { %1997 = vmatmul.mubr.msk.bf16.vlgmr.msra.gmra.mrb[24].mxu1 %vm830_vm5, %v801_v46 }
 0x7c6   :  { %2016 = vmatprep.mubr.msk.bf16.mxu1 %vm2254_vm0, %v2253_v1 }
 0x898   :  { %v868_v48 = vpop.f32.mrb[24].mxu1 }
 0x899   :  { %v869_v49 = vadd.f32 %v868_v48, %v805_v47  ;;  %v1998_v53 = vpop.f32.mrb[25].mxu1 }
 0x89a   :  { %v871_v54 = vpop.f32.mrb[26].mxu1 }
 0x89b   :  { %v872_v55 = vadd.f32 %v871_v54, %v805_v47  ;;  %v1999_v57 = vpop.f32.mrb[27].mxu1  ;;  %v875_v58 = vadd.f32 %v869_v49, %v740_v27  ;;  %v912_v47 = vrot.slane %v2345_v9, %v911_v40 }
 0x89d   :  { %v877_v59 = vsel %vm68_vm1, %v875_v58, 0.0  ;;  %v876_v60 = vadd.f32 %v872_v55, %v741_v28  ;;  %v2619_v55 = vld [vmem:[%s2800_s4 + $0x8] sm:$0xff] }
 0x89e   :  { %878 = vadd.xlane.f32.xlu1 %v877_v59  ;;  %v919_v9 = vrot.slane %v2619_v55, %v2340_v8 }
 0x89f   :  { %v880_v61 = vsel %vm68_vm1, %v876_v60, 0.0 }
 0x8a0   :  { %881 = vadd.xlane.f32.xlu0 %v880_v61 }
 0x8af   :  { %930 = vrot.lane.b32.xlu1 %v2472_v50, %s2263_s25  ;;  %v2578_v50 = vld [vmem:[%s2798_s2 + $0x20] ss:$12 sps:$4 sm:$0xff]  }
 0x92b   :  { %v879_v62 = vpop.xlane.xlu1 %878 }
 0x92c   :  { %v883_v5 = vmul.f32 0.03125, %v879_v62 }
 0x92d   :  { %v882_v3 = vpop.xlane.xlu0 %881 }
 0x92e   :  { %v885_v10 = vsub.f32 %v875_v58, %v883_v5  ;;  %v884_v11 = vmul.f32 0.03125, %v882_v3 }
 0x92f   :  { %v931_v20 = vpop.permute.xlu1 %930 }
 0x930   :  { %v886_v0 = vsub.f32 %v876_v60, %v884_v11  ;;  %v887_v13 = vmul.f32 %v885_v10, %v885_v10 }
 0x932   :  { %v889_v14 = vsel %vm68_vm1, %v887_v13, 0.0  ;;  %v888_v15 = vmul.f32 %v886_v0, %v886_v0 }
 0x933   :  { %890 = vadd.xlane.f32.xlu1 %v889_v14 }
 0x934   :  { %v892_v18 = vsel %vm68_vm1, %v888_v15, 0.0 }
 0x935   :  { %893 = vadd.xlane.f32.xlu0 %v892_v18 }
 0x944   :  { %934 = vrot.lane.b32.xlu1 %v2480_v52, %s2263_s25 }
 0x948   :  { %936 = vrot.lane.b32.xlu1 %v2578_v50, %s2263_s25 }
 0x94b   :  { %932 = vrot.lane.b32.xlu0 %v2583_v19, %s2263_s25 }
 0x9c0   :  { %v891_v22 = vpop.xlane.xlu1 %890 }
 0x9c1   :  { %v895_v23 = vmul.f32 0.03125, %v891_v22 }
 0x9c2   :  { %v894_v52 = vpop.xlane.xlu0 %893 }
 0x9c3   :  { %v897_v24 = vadd.f32 1e-05, %v895_v23  ;;  %v896_v25 = vmul.f32 0.03125, %v894_v52 }
 0x9c4   :  { %v935_v26 = vpop.permute.xlu1 %934 }
 0x9c5   :  { %2181 = vrsqrt.f32 %v897_v24  ;;  %v898_v27 = vadd.f32 1e-05, %v896_v25 }
 0x9c6   :  { %v2589_v28 = vpop.permute.xlu0 %932 }
 0x9c7   :  { %2183 = vrsqrt.f32 %v898_v27  ;;  %v939_v17 = vsel %vm830_vm5, %v931_v20, %v2589_v28 }
 0x9c8   :  { %2001 = vmatpush3.bf16.msra.mxu0 %v939_v17  ;;  %v2593_v2 = vpop.permute.xlu1 %936 }
 0x9c9   :  { %v940_v33 = vsel %vm830_vm5, %v935_v26, %v2593_v2  ;;  %2002 = vmatprep.subr.bf16.mxu0 %v2253_v1 }
 0x9cc   :  { %2003 = vmatpush3.bf16.msra.mxu0 %v940_v33 }
 0x9cd   :  { %2008 = vmatprep.subr.bf16.mxu0 %v2253_v1 }
 0x9cf   :  { %v2182_v41 = vpop.eup %2181 }
 0x9d0   :  { %v901_v42 = vmul.f32 %v2182_v41, %v885_v10 }
 0x9d1   :  { %v2184_v37 = vpop.eup %2183 }
 0x9d2   :  { %v907_v44 = vmul.f32 %v906_v36, %v901_v42  ;;  %v902_v46 = vmul.f32 %v2184_v37, %v886_v0 }
 0x9d4   :  { %v908_v48 = vmul.f32 %v906_v36, %v902_v46  ;;  %v2607_v49 = vadd.f32 %v912_v47, %v907_v44 }
 0x9d6   :  { %v2609_v53 = vadd.f32 %v912_v47, %v908_v48 }
 0x9d8   :  { %v915_v54 = vpack.c.bf16 %v2609_v53, %v2607_v49 }
 0x9da   :  { %2005 = vmatmul.mubr.msk.bf16.vlgmr.msra.gmra.mrb[20].mxu0 %vm68_vm1, %v915_v54 }
 0x9db   :  { %2010 = vmatprep.mubr.msk.bf16.mxu0 %vm2254_vm0, %v2253_v1 }
 0xaad   :  { %v980_v57 = vpop.f32.mrb[20].mxu0 }
 0xaae   :  { %v2006_v58 = vpop.f32.mrb[21].mxu0  ;;  %v981_v60 = vadd.f32 %v980_v57, %v919_v9 }
 0xaaf   :  { %v983_v59 = vpop.f32.mrb[22].mxu0 }
 0xab0   :  { %v984_v61 = vadd.f32 %v983_v59, %v919_v9  ;;  %v2007_v62 = vpop.f32.mrb[23].mxu0 }
 0xab2   :  { %v2623_v5 = vpack.c.bf16 %v984_v61, %v981_v60 }
 0xab4   :  { %1040 = vrot.lane.b32.xlu1 %v2623_v5, %s2258_s30  ;;  %989 = vrot.lane.b32.xlu0 %v2623_v5, %s2256_s28 }
 0xab8   :  { %1038 = vrot.lane.b32.xlu1 %v2623_v5, %s2257_s29  ;;  %1091 = vrot.lane.b32.xlu0 %v2623_v5, %s2255_s27  ;;  %s2270_s29 = smov [#allocation2]  }
 0xab9   :  { %s1811_s30 = sshll.u32 %s2270_s29, 4  ;;  %s1812_s30 = int_to_ptr.vmem [resolvable:$true] %s1811_s30 }
 0xaba   :  { %p2234_p1 = scmp.lt.s32.totalorder %s1812_s30, %s1812_s30 }
 0xabc   :  { %1089 = vrot.lane.b32.xlu1 %v2623_v5, %s2259_s6  ;;  %1142 = vrot.lane.b32.xlu0 %v2623_v5, %s2260_s7 }
 0xac0   :  { %1140 = vrot.lane.b32.xlu0 %v2623_v5, %s2261_s8 }
 0xb26   :  { %v1041_v3 = vpop.permute.xlu1 %1040  ;;  %v990_v10 = vpop.permute.xlu0 %989 }
 0xb27   :  { %v1046_v11 = vsel %vm117_vm2, %v1041_v3, 0  ;;  %v995_v0 = vsel %vm117_vm2, %v990_v10, 0 }
 0xb28   :  { %2009 = vmatpush3.bf16.xpose.msra.mxu0 %v995_v0  ;;  %2015 = vmatpush3.bf16.xpose.msra.mxu1 %v1046_v11 }
 0xb29   :  { %2020 = vmatprep.subr.bf16.mxu0 %v2253_v1  ;;  %2026 = vmatprep.subr.bf16.mxu1 %v2253_v1 }
 0xb2a   :  { %v1092_v13 = vpop.permute.xlu0 %1091  ;;  %v1039_v14 = vpop.permute.xlu1 %1038 }
 0xb2b   :  { %v1097_v18 = vsel %vm117_vm2, %v1092_v13, 0 }
 0xb2e   :  { %v1143_v15 = vpop.permute.xlu0 %1142  ;;  %v1090_v22 = vpop.permute.xlu1 %1089 }
 0xb2f   :  { %v1148_v20 = vsel %vm117_vm2, %v1143_v15, 0  ;;  %2011 = vmatmul.mubr.msk.bf16.vlgmr.msra.gmra.mrb[24].mxu0 %vm117_vm2, %v2623_v5  ;;  %2017 = vmatmul.mubr.msk.bf16.vlgmr.msra.gmra.mrb[28].mxu1 %vm117_vm2, %v1039_v14 }
 0xb30   :  { %2021 = vmatpush3.bf16.xpose.msra.mxu0 %v1097_v18  ;;  %2027 = vmatpush3.bf16.xpose.msra.mxu1 %v1148_v20 }
 0xb31   :  { %2022 = vmatprep.mubr.msk.bf16.mxu0 %vm2254_vm0, %v2253_v1  ;;  %2028 = vmatprep.mubr.msk.bf16.mxu1 %vm2254_vm0, %v2253_v1 }
 0xb32   :  { %2032 = vmatprep.subr.bf16.mxu0 %v2253_v1  ;;  %2038 = vmatprep.subr.bf16.mxu1 %v2253_v1  ;;  %v1141_v23 = vpop.permute.xlu0 %1140 }
 0xb37   :  { %2023 = vmatmul.mubr.msk.bf16.vlgmr.msra.gmra.mrb[28].mxu0 %vm117_vm2, %v1090_v22  ;;  %2029 = vmatmul.mubr.msk.bf16.vlgmr.msra.gmra.mrb[32].mxu1 %vm117_vm2, %v1141_v23 }
 0xb38   :  { %2034 = vmatprep.mubr.msk.bf16.mxu0 %vm2254_vm0, %v2253_v1  ;;  %2040 = vmatprep.mubr.msk.bf16.mxu1 %vm2254_vm0, %v2253_v1 }
 0xc02   :  { %v1031_v52 = vpop.f32.mrb[24].mxu0  ;;  %v1082_v24 = vpop.f32.mrb[28].mxu1 }
 0xc03   :  { %v1191_v25 = vmul.f32 0.35355338, %v1031_v52  ;;  %v2012_v26 = vpop.f32.mrb[25].mxu0  ;;  %v2018_v27 = vpop.f32.mrb[29].mxu1  ;;  %v1193_v17 = vmul.f32 0.35355338, %v1082_v24 }
 0xc04   :  { %v1034_v33 = vpop.f32.mrb[26].mxu0  ;;  %v1085_v36 = vpop.f32.mrb[30].mxu1 }
 0xc05   :  { %v1192_v41 = vmul.f32 0.35355338, %v1034_v33  ;;  %v1194_v42 = vmul.f32 0.35355338, %v1085_v36  ;;  %v2013_v37 = vpop.f32.mrb[27].mxu0  ;;  %v2019_v44 = vpop.f32.mrb[31].mxu1  ;;  %v1199_v46 = vadd.f32 %v1191_v25, %v2389_v30  ;;  %v1201_v9 = vadd.f32 %v1193_v17, %v2400_v39 }
 0xc07   :  { %v1207_v47 = vsel %vm334_vm3, %v1199_v46, -inf  ;;  %v1200_v48 = vadd.f32 %v1192_v41, %v2394_v34  ;;  %v1202_v54 = vadd.f32 %v1194_v42, %v2407_v45  ;;  %v1213_v34 = vsel %vm334_vm3, %v1201_v9, -inf }
 0xc08   :  { %1208 = vmax.xlane.f32.xlu1 %v1207_v47 }
 0xc09   :  { %v1210_v57 = vsel %vm334_vm3, %v1200_v48, -inf  ;;  %v1216_v3 = vsel %vm334_vm3, %v1202_v54, -inf }
 0xc0a   :  { %1211 = vmax.xlane.f32.xlu0 %v1210_v57  ;;  %v1133_v58 = vpop.f32.mrb[28].mxu0  ;;  %v1184_v59 = vpop.f32.mrb[32].mxu1 }
 0xc0b   :  { %v1195_v60 = vmul.f32 0.35355338, %v1133_v58  ;;  %v2024_v61 = vpop.f32.mrb[29].mxu0  ;;  %v2030_v62 = vpop.f32.mrb[33].mxu1  ;;  %v1197_v30 = vmul.f32 0.35355338, %v1184_v59 }
 0xc0c   :  { %v1136_v10 = vpop.f32.mrb[30].mxu0  ;;  %1217 = vmax.xlane.f32.xlu1 %v1216_v3  ;;  %v1187_v11 = vpop.f32.mrb[34].mxu1 }
 0xc0d   :  { %v1196_v45 = vmul.f32 0.35355338, %v1136_v10  ;;  %v1198_v0 = vmul.f32 0.35355338, %v1187_v11  ;;  %v2025_v13 = vpop.f32.mrb[31].mxu0  ;;  %v2031_v39 = vpop.f32.mrb[35].mxu1  ;;  %v1203_v14 = vadd.f32 %v1195_v60, %v2414_v51  ;;  %v1205_v22 = vadd.f32 %v1197_v30, %v2428_v63 }
 0xc0e   :  { %1214 = vmax.xlane.f32.xlu0 %v1213_v34 }
 0xc0f   :  { %v1204_v15 = vadd.f32 %v1196_v45, %v2420_v56  ;;  %v1219_v18 = vsel %vm334_vm3, %v1203_v14, -inf  ;;  %v1206_v23 = vadd.f32 %v1198_v0, %v2434_v12  ;;  %v1225_v52 = vsel %vm334_vm3, %v1205_v22, -inf }
 0xc11   :  { %v1222_v20 = vsel %vm334_vm3, %v1204_v15, -inf  ;;  %v1228_v24 = vsel %vm334_vm3, %v1206_v23, -inf }
 0xc12   :  { %1220 = vmax.xlane.f32.xlu0 %v1219_v18  ;;  %1223 = vmax.xlane.f32.xlu1 %v1222_v20 }
 0xc16   :  { %1226 = vmax.xlane.f32.xlu0 %v1225_v52  ;;  %1229 = vmax.xlane.f32.xlu1 %v1228_v24 }
 0xc27   :  { %1346 = vrot.lane.b32.xlu1 %v2623_v5, %s2262_s1 }
 0xc2c   :  { %1299 = vrot.lane.b32.xlu0 %v2623_v5, %s2263_s25 }
 0xc95   :  { %v1209_v51 = vpop.xlane.xlu1 %1208 }
 0xc96   :  { %v1231_v56 = vsub.f32 %v1199_v46, %v1209_v51 }
 0xc97   :  { %v1212_v25 = vpop.xlane.xlu0 %1211 }
 0xc98   :  { %v1239_v63 = vmul.f32 1.442695, %v1231_v56  ;;  %v1232_v26 = vsub.f32 %v1200_v48, %v1212_v25 }
 0xc99   :  { %v1218_v12 = vpop.xlane.xlu1 %1217 }
 0xc9a   :  { %2185 = vpow2.f32 %v1239_v63  ;;  %v1241_v27 = vmul.f32 1.442695, %v1232_v26  ;;  %v1234_v17 = vsub.f32 %v1202_v54, %v1218_v12 }
 0xc9b   :  { %v1215_v33 = vpop.xlane.xlu0 %1214 }
 0xc9c   :  { %2187 = vpow2.f32 %v1241_v27  ;;  %v1245_v36 = vmul.f32 1.442695, %v1234_v17  ;;  %v1233_v41 = vsub.f32 %v1201_v9, %v1215_v33 }
 0xc9e   :  { %2189 = vpow2.f32 %v1245_v36  ;;  %v1243_v42 = vmul.f32 1.442695, %v1233_v41 }
 0xc9f   :  { %v1221_v37 = vpop.xlane.xlu0 %1220  ;;  %v1224_v44 = vpop.xlane.xlu1 %1223 }
 0xca0   :  { %2191 = vpow2.f32 %v1243_v42  ;;  %v1235_v47 = vsub.f32 %v1203_v14, %v1221_v37  ;;  %v1236_v57 = vsub.f32 %v1204_v15, %v1224_v44 }
 0xca2   :  { %v1247_v58 = vmul.f32 1.442695, %v1235_v47  ;;  %v1249_v46 = vmul.f32 1.442695, %v1236_v57 }
 0xca3   :  { %v1227_v59 = vpop.xlane.xlu0 %1226  ;;  %v1230_v60 = vpop.xlane.xlu1 %1229 }
 0xca4   :  { %v2186_v48 = vpop.eup %2185  ;;  %2193 = vpow2.f32 %v1247_v58  ;;  %v1237_v61 = vsub.f32 %v1205_v22, %v1227_v59  ;;  %v1238_v62 = vsub.f32 %v1206_v23, %v1230_v60 }
 0xca5   :  { %2195 = vpow2.f32 %v1249_v46  ;;  %v1255_v54 = vsel %vm334_vm3, %v2186_v48, 0.0 }
 0xca6   :  { %v2188_v3 = vpop.eup %2187  ;;  %v1251_v9 = vmul.f32 1.442695, %v1237_v61  ;;  %v1253_v30 = vmul.f32 1.442695, %v1238_v62  ;;  %1256 = vadd.xlane.f32.xlu0 %v1255_v54 }
 0xca7   :  { %v1300_v10 = vpop.permute.xlu0 %1299  ;;  %v1347_v11 = vpop.permute.xlu1 %1346  ;;  %v1258_v34 = vsel %vm334_vm3, %v2188_v3, 0.0 }
 0xca8   :  { %v2190_v45 = vpop.eup %2189  ;;  %2197 = vpow2.f32 %v1251_v9  ;;  %2033 = vmatpush3.bf16.msra.mxu0 %v1300_v10  ;;  %1259 = vadd.xlane.f32.xlu1 %v1258_v34 }
 0xca9   :  { %2199 = vpow2.f32 %v1253_v30  ;;  %2039 = vmatpush3.bf16.msra.mxu1 %v1347_v11  ;;  %2044 = vmatprep.subr.bf16.mxu0 %v2253_v1  ;;  %v1264_v39 = vsel %vm334_vm3, %v2190_v45, 0.0 }
 0xcaa   :  { %v2192_v0 = vpop.eup %2191  ;;  %2050 = vmatprep.subr.bf16.mxu1 %v2253_v1 }
 0xcab   :  { %v1261_v13 = vsel %vm334_vm3, %v2192_v0, 0.0 }
 0xcac   :  { %1262 = vadd.xlane.f32.xlu0 %v1261_v13  ;;  %1265 = vadd.xlane.f32.xlu1 %v1264_v39 }
 0xcae   :  { %v2194_v14 = vpop.eup %2193 }
 0xcaf   :  { %v2196_v15 = vpop.eup %2195  ;;  %v1267_v18 = vsel %vm334_vm3, %v2194_v14, 0.0 }
 0xcb0   :  { %1268 = vadd.xlane.f32.xlu0 %v1267_v18  ;;  %v1270_v20 = vsel %vm334_vm3, %v2196_v15, 0.0 }
 0xcb1   :  { %1271 = vadd.xlane.f32.xlu1 %v1270_v20 }
 0xcb2   :  { %v2198_v22 = vpop.eup %2197 }
 0xcb3   :  { %v2200_v23 = vpop.eup %2199  ;;  %v1273_v52 = vsel %vm334_vm3, %v2198_v22, 0.0 }
 0xcb4   :  { %1274 = vadd.xlane.f32.xlu0 %v1273_v52  ;;  %v1276_v24 = vsel %vm334_vm3, %v2200_v23, 0.0 }
 0xcb5   :  { %1277 = vadd.xlane.f32.xlu1 %v1276_v24 }
 0xcc6   :  { %1393 = vrot.lane.b32.xlu1 %v2623_v5, %s2264_s0 }
 0xcca   :  { %1440 = vrot.lane.b32.xlu0 %v2623_v5, %s2265_s26  ;;  %1522 = vrot.lane.b32.xlu1 %v2583_v19, %s2256_s28 }
 0xd33   :  { %v1257_v51 = vpop.xlane.xlu0 %1256 }
 0xd34   :  { %2201 = vrcp.f32 %v1257_v51 }
 0xd35   :  { %v1260_v56 = vpop.xlane.xlu1 %1259 }
 0xd36   :  { %2203 = vrcp.f32 %v1260_v56 }
 0xd39   :  { %v1263_v25 = vpop.xlane.xlu0 %1262  ;;  %v1266_v63 = vpop.xlane.xlu1 %1265 }
 0xd3a   :  { %2205 = vrcp.f32 %v1263_v25 }
 0xd3b   :  { %2207 = vrcp.f32 %v1266_v63 }
 0xd3d   :  { %v1269_v26 = vpop.xlane.xlu0 %1268 }
 0xd3e   :  { %v2202_v12 = vpop.eup %2201  ;;  %2209 = vrcp.f32 %v1269_v26  ;;  %v1272_v27 = vpop.xlane.xlu1 %1271 }
 0xd3f   :  { %2211 = vrcp.f32 %v1272_v27  ;;  %v1287_v33 = vmul.f32 %v2202_v12, %v2186_v48 }
 0xd40   :  { %v2204_v17 = vpop.eup %2203 }
 0xd41   :  { %v1288_v36 = vmul.f32 %v2204_v17, %v2188_v3  ;;  %v1275_v5 = vpop.xlane.xlu0 %1274 }
 0xd42   :  { %2213 = vrcp.f32 %v1275_v5  ;;  %v1278_v41 = vpop.xlane.xlu1 %1277 }
 0xd43   :  { %2215 = vrcp.f32 %v1278_v41  ;;  %v1295_v19 = vpack.c.bf16 %v1288_v36, %v1287_v33 }
 0xd44   :  { %v2206_v42 = vpop.eup %2205 }
 0xd45   :  { %v2208_v37 = vpop.eup %2207  ;;  %v1289_v44 = vmul.f32 %v2206_v42, %v2192_v0  ;;  %2035 = vmatmul.mubr.msk.bf16.vlgmr.msra.gmra.mrb[32].mxu0 %vm334_vm3, %v1295_v19  ;;  %v1441_v61 = vpop.permute.xlu0 %1440 }
 0xd46   :  { %v1290_v47 = vmul.f32 %v2208_v37, %v2190_v45  ;;  %v1394_v57 = vpop.permute.xlu1 %1393  ;;  %2046 = vmatprep.mubr.msk.bf16.mxu0 %vm2254_vm0, %v2253_v1 }
 0xd47   :  { %2045 = vmatpush3.bf16.msra.mxu0 %v1394_v57 }
 0xd48   :  { %v2210_v58 = vpop.eup %2209  ;;  %v1296_v46 = vpack.c.bf16 %v1290_v47, %v1289_v44  ;;  %2056 = vmatprep.subr.bf16.mxu0 %v2253_v1 }
 0xd49   :  { %v2212_v59 = vpop.eup %2211  ;;  %v1291_v60 = vmul.f32 %v2210_v58, %v2194_v14 }
 0xd4a   :  { %v1292_v48 = vmul.f32 %v2212_v59, %v2196_v15  ;;  %2041 = vmatmul.mubr.msk.bf16.vlgmr.msra.gmra.mrb[36].mxu1 %vm334_vm3, %v1296_v46  ;;  %v1523_v11 = vpop.permute.xlu1 %1522  ;;  %v1521_v59 = vrot.slane %v2619_v55, %v2507_v38 }
 0xd4b   :  { %2051 = vmatpush3.bf16.msra.mxu1 %v1441_v61  ;;  %2052 = vmatprep.mubr.msk.bf16.mxu1 %vm2254_vm0, %v2253_v1 }
 0xd4c   :  { %v2214_v62 = vpop.eup %2213  ;;  %v1297_v54 = vpack.c.bf16 %v1292_v48, %v1291_v60  ;;  %2064 = vmatprep.subr.bf16.mxu1 %v2253_v1 }
 0xd4d   :  { %v2216_v3 = vpop.eup %2215  ;;  %v1293_v9 = vmul.f32 %v2214_v62, %v2198_v22 }
 0xd4e   :  { %v1294_v30 = vmul.f32 %v2216_v3, %v2200_v23  ;;  %2047 = vmatmul.mubr.msk.bf16.vlgmr.msra.gmra.mrb[36].mxu0 %vm334_vm3, %v1297_v54 }
 0xd4f   :  { %2060 = vmatprep.mubr.msk.bf16.mxu0 %vm2254_vm0, %v2253_v1  ;;  %2057 = vmatpush3.bf16.msra.mxu0 %v1523_v11 }
 0xd50   :  { %v1298_v10 = vpack.c.bf16 %v1294_v30, %v1293_v9  ;;  %2058 = vmatprep.subr.bf16.mxu0 %v2253_v1 }
 0xd52   :  { %2053 = vmatmul.mubr.msk.bf16.vlgmr.msra.gmra.mrb[40].mxu1 %vm334_vm3, %v1298_v10 }
 0xd53   :  { %2065 = vmatpush3.bf16.msra.mxu1 %v2589_v28  ;;  %2068 = vmatprep.mubr.msk.bf16.mxu1 %vm2254_vm0, %v2253_v1 }
 0xd54   :  { %2066 = vmatprep.subr.bf16.mxu1 %v2253_v1 }
 0xd57   :  { %2067 = vmatpush3.bf16.msra.mxu1 %v2593_v2 }
 0xe18   :  { %v1339_v34 = vpop.f32.mrb[32].mxu0 }
 0xe19   :  { %v2036_v45 = vpop.f32.mrb[33].mxu0 }
 0xe1a   :  { %v1342_v0 = vpop.f32.mrb[34].mxu0 }
 0xe1b   :  { %v2037_v13 = vpop.f32.mrb[35].mxu0 }
 0xe1d   :  { %v1386_v39 = vpop.f32.mrb[36].mxu1 }
 0xe1e   :  { %v2042_v14 = vpop.f32.mrb[37].mxu1 }
 0xe1f   :  { %v1389_v15 = vpop.f32.mrb[38].mxu1 }
 0xe20   :  { %v2118_v18 = vpack.i.bf16 %v1389_v15, %v1386_v39  ;;  %v2043_v28 = vpop.f32.mrb[39].mxu1 }
 0xe21   :  { %v1433_v20 = vpop.f32.mrb[36].mxu0 }
 0xe22   :  { %v2048_v22 = vpop.f32.mrb[37].mxu0  ;;  %2119 = vrot.lane.b32.xlu0 %v2118_v18, %s2267_s14 }
 0xe23   :  { %v1436_v23 = vpop.f32.mrb[38].mxu0 }
 0xe24   :  { %v2123_v52 = vpack.i.bf16 %v1436_v23, %v1433_v20  ;;  %v2049_v2 = vpop.f32.mrb[39].mxu0 }
 0xe25   :  { %v1480_v24 = vpop.f32.mrb[40].mxu1 }
 0xe26   :  { %2124 = vrot.lane.b32.xlu1 %v2123_v52, %s2268_s15  ;;  %v2054_v51 = vpop.f32.mrb[41].mxu1 }
 0xe27   :  { %v1483_v56 = vpop.f32.mrb[42].mxu1 }
 0xe28   :  { %v2128_v25 = vpack.i.bf16 %v1483_v56, %v1480_v24  ;;  %v2055_v63 = vpop.f32.mrb[43].mxu1 }
 0xe29   :  { %v1609_v63 = vrot.slane %v2619_v55, %v738_v21 }
 0xe2a   :  { %2129 = vrot.lane.b32.xlu0 %v2128_v25, %s2269_s16  ;;  %1524 = vrot.lane.b32.xlu1 %v2578_v50, %s2256_s28 }
 0xe94   :  { %v2120_v26 = vpop.permute.xlu0 %2119 }
 0xe95   :  { %v2122_v27 = vunpack.i.h.bf16 %v2120_v26  ;;  %v2121_v17 = vunpack.i.l.bf16 %v2120_v26 }
 0xe97   :  { %v1512_v19 = vsel %vm117_vm2, %v1342_v0, %v2122_v27  ;;  %v1511_v42 = vsel %vm117_vm2, %v1339_v34, %v2121_v17 }
 0xe98   :  { %v2125_v12 = vpop.permute.xlu1 %2124 }
 0xe99   :  { %v2127_v33 = vunpack.i.h.bf16 %v2125_v12  ;;  %v2126_v36 = vunpack.i.l.bf16 %v2125_v12 }
 0xe9b   :  { %v1513_v47 = vsel %vm334_vm3, %v1511_v42, %v2126_v36  ;;  %v1514_v57 = vsel %vm334_vm3, %v1512_v19, %v2127_v33 }
 0xe9c   :  { %v2130_v5 = vpop.permute.xlu0 %2129  ;;  %v1525_v41 = vpop.permute.xlu1 %1524 }
 0xe9d   :  { %v2132_v37 = vunpack.i.h.bf16 %v2130_v5  ;;  %v2131_v44 = vunpack.i.l.bf16 %v2130_v5  ;;  %2059 = vmatpush3.bf16.msra.mxu0 %v1525_v41 }
 0xe9e   :  { %2072 = vmatprep.subr.bf16.mxu0 %v2253_v1 }
 0xe9f   :  { %v1516_v50 = vsel %vm643_vm4, %v1514_v57, %v2132_v37  ;;  %v1515_v58 = vsel %vm643_vm4, %v1513_v47, %v2131_v44 }
 0xea0   :  { %v1517_v46 = vpack.c.bf16 %v1516_v50, %v1515_v58 }
 0xea2   :  { %2061 = vmatmul.mubr.msk.bf16.vlgmr.msra.gmra.mrb[40].mxu0 %vm68_vm1, %v1517_v46 }
 0xea3   :  { %2080 = vmatprep.mubr.msk.bf16.mxu0 %vm2254_vm0, %v2253_v1 }
 0xf75   :  { %v1565_v60 = vpop.f32.mrb[40].mxu0 }
 0xf76   :  { %v1566_v48 = vadd.f32 %v1565_v60, %v1521_v59  ;;  %v2062_v61 = vpop.f32.mrb[41].mxu0 }
 0xf77   :  { %v1568_v62 = vpop.f32.mrb[42].mxu0 }
 0xf78   :  { %v1569_v54 = vadd.f32 %v1568_v62, %v1521_v59  ;;  %v2063_v3 = vpop.f32.mrb[43].mxu0  ;;  %v1572_v9 = vadd.f32 %v1566_v48, %v2607_v49 }
 0xf7a   :  { %v1574_v30 = vsel %vm68_vm1, %v1572_v9, 0.0  ;;  %v1573_v10 = vadd.f32 %v1569_v54, %v2609_v53 }
 0xf7b   :  { %1575 = vadd.xlane.f32.xlu0 %v1574_v30 }
 0xf7c   :  { %v1577_v11 = vsel %vm68_vm1, %v1573_v10, 0.0 }
 0xf7d   :  { %1578 = vadd.xlane.f32.xlu1 %v1577_v11 }
 0xf8e   :  { %1670 = vrot.lane.b32.xlu1 %v2520_v4, %s2256_s28 }
 0xf92   :  { %1674 = vrot.lane.b32.xlu1 %v2545_v29, %s2256_s28 }
 0xf96   :  { %1676 = vrot.lane.b32.xlu1 %v2552_v31, %s2256_s28 }
0x1008   :  { %v1576_v34 = vpop.xlane.xlu0 %1575 }
0x1009   :  { %v1580_v45 = vmul.f32 0.03125, %v1576_v34 }
0x100a   :  { %v1579_v49 = vpop.xlane.xlu1 %1578 }
0x100b   :  { %v1582_v0 = vsub.f32 %v1572_v9, %v1580_v45  ;;  %v1581_v13 = vmul.f32 0.03125, %v1579_v49 }
0x100d   :  { %v1583_v39 = vsub.f32 %v1573_v10, %v1581_v13  ;;  %v1584_v53 = vmul.f32 %v1582_v0, %v1582_v0 }
0x100e   :  { %v1671_v4 = vpop.permute.xlu1 %1670 }
0x100f   :  { %v1586_v14 = vsel %vm68_vm1, %v1584_v53, 0.0  ;;  %v1585_v15 = vmul.f32 %v1583_v39, %v1583_v39  ;;  %2073 = vmatpush3.bf16.msra.mxu0 %v1671_v4  ;;  %v1757_v4 = vrot.slane %v2619_v55, %v905_v35 }
0x1010   :  { %1587 = vadd.xlane.f32.xlu0 %v1586_v14  ;;  %2074 = vmatprep.subr.bf16.mxu0 %v2253_v1 }
0x1011   :  { %v1589_v18 = vsel %vm68_vm1, %v1585_v15, 0.0 }
0x1012   :  { %v1675_v33 = vpop.permute.xlu1 %1674 }
0x1014   :  { %1590 = vadd.xlane.f32.xlu0 %v1589_v18 }
0x1016   :  { %v1677_v36 = vpop.permute.xlu1 %1676 }
0x102a   :  { %1672 = vrot.lane.b32.xlu0 %v2526_v6, %s2256_s28  ;;  %v1603_v6 = vrot.slane %v2619_v55, %v732_v16  ;;  %v1616_v16 = vrot.slane %v2619_v55, %v745_v32 }
0x109d   :  { %v1588_v29 = vpop.xlane.xlu0 %1587 }
0x109e   :  { %v1592_v31 = vmul.f32 0.03125, %v1588_v29 }
0x10a0   :  { %v1594_v28 = vadd.f32 1e-05, %v1592_v31 }
0x10a1   :  { %v1591_v20 = vpop.xlane.xlu0 %1590 }
0x10a2   :  { %2217 = vrsqrt.f32 %v1594_v28  ;;  %v1593_v22 = vmul.f32 0.03125, %v1591_v20  ;;  %v1763_v28 = vrot.slane %v2619_v55, %v911_v40 }
0x10a4   :  { %v1595_v23 = vadd.f32 1e-05, %v1593_v22 }
0x10a5   :  { %v1673_v52 = vpop.permute.xlu0 %1672 }
0x10a6   :  { %2219 = vrsqrt.f32 %v1595_v23  ;;  %2075 = vmatpush3.bf16.msra.mxu0 %v1673_v52 }
0x10a7   :  { %2076 = vmatprep.subr.bf16.mxu0 %v2253_v1 }
0x10aa   :  { %2077 = vmatpush3.bf16.msra.mxu0 %v1675_v33 }
0x10ab   :  { %2078 = vmatprep.subr.bf16.mxu0 %v2253_v1  ;;  %v1669_v1 = vrot.slane %v2619_v55, %v804_v43 }
0x10ac   :  { %v2218_v2 = vpop.eup %2217 }
0x10ad   :  { %v1598_v24 = vmul.f32 %v2218_v2, %v1582_v0 }
0x10ae   :  { %2079 = vmatpush3.bf16.msra.mxu0 %v1677_v36 }
0x10af   :  { %v1604_v56 = vmul.f32 %v1603_v6, %v1598_v24 }
0x10b0   :  { %v2220_v51 = vpop.eup %2219 }
0x10b1   :  { %v1599_v25 = vmul.f32 %v2220_v51, %v1583_v39  ;;  %v1610_v12 = vadd.f32 %v1609_v63, %v1604_v56 }
0x10b3   :  { %v1605_v26 = vmul.f32 %v1603_v6, %v1599_v25 }
0x10b5   :  { %v1611_v27 = vadd.f32 %v1609_v63, %v1605_v26 }
0x10b7   :  { %v1612_v17 = vpack.c.bf16 %v1611_v27, %v1610_v12 }
0x10b9   :  { %2069 = vmatmul.mubr.msk.bf16.vlgmr.msra.gmra.mrb[44].mxu1 %vm68_vm1, %v1612_v17 }
0x118c   :  { %v1656_v5 = vpop.f32.mrb[44].mxu1 }
0x118d   :  { %v1657_v41 = vadd.f32 %v1656_v5, %v1616_v16  ;;  %v2070_v19 = vpop.f32.mrb[45].mxu1 }
0x118e   :  { %v1659_v21 = vpop.f32.mrb[46].mxu1  ;;  %v50_v19 = vld [vmem:[%s2800_s4 + $0x10] sm:$0x3]  ;;  %s2229_s4 = scalar_lea.vmem %s1812_s30, 256 }
0x118f   :  { %v1660_v42 = vadd.f32 %v1659_v21, %v1616_v16  ;;  %v2071_v37 = vpop.f32.mrb[47].mxu1  ;;  %v1663_v44 = vmax.f32 %v1657_v41, 0.0  ;;  %v1795_v21 = vrot.slane %v50_v19, %v2340_v8  ;;  %p2230_p0 = scmp.ne.s32.totalorder %s1812_s30, %s2229_s4  ;;  %p2235_p2 = scmp.lt.s32.totalorder %s2229_s4, %s2229_s4 }
0x1190   :  { %v1801_v37 = vrot.slane %v50_v19, %v2507_v38 }
0x1191   :  { %v1664_v47 = vmax.f32 %v1660_v42, 0.0  ;;  %p2236_p3 = por %p2235_p2, %p2234_p1 }
0x1193   :  { %v1665_v57 = vpack.c.bf16 %v1664_v47, %v1663_v44  ;;  %p2237_p4 = pnand %p2236_p3, %p2230_p0 }
0x1195   :  { %2081 = vmatmul.mubr.msk.bf16.vlgmr.msra.gmra.mrb[44].mxu0 %vm830_vm5, %v1665_v57 }
0x1268   :  { %v1719_v50 = vpop.f32.mrb[44].mxu0 }
0x1269   :  { %v1720_v58 = vadd.f32 %v1719_v50, %v1669_v1  ;;  %v2082_v46 = vpop.f32.mrb[45].mxu0 }
0x126a   :  { %v1722_v59 = vpop.f32.mrb[46].mxu0 }
0x126b   :  { %v1723_v32 = vadd.f32 %v1722_v59, %v1669_v1  ;;  %v2083_v60 = vpop.f32.mrb[47].mxu0  ;;  %v1726_v48 = vadd.f32 %v1720_v58, %v1610_v12 }
0x126d   :  { %v1728_v61 = vsel %vm68_vm1, %v1726_v48, 0.0  ;;  %v1727_v62 = vadd.f32 %v1723_v32, %v1611_v27 }
0x126e   :  { %1729 = vadd.xlane.f32.xlu0 %v1728_v61 }
0x126f   :  { %v1731_v54 = vsel %vm68_vm1, %v1727_v62, 0.0 }
0x1270   :  { %1732 = vadd.xlane.f32.xlu1 %v1731_v54 }
0x12fb   :  { %v1730_v3 = vpop.xlane.xlu0 %1729 }
0x12fc   :  { %v1734_v9 = vmul.f32 0.03125, %v1730_v3 }
0x12fd   :  { %v1733_v30 = vpop.xlane.xlu1 %1732 }
0x12fe   :  { %v1736_v10 = vsub.f32 %v1726_v48, %v1734_v9  ;;  %v1735_v11 = vmul.f32 0.03125, %v1733_v30 }
0x1300   :  { %v1737_v43 = vsub.f32 %v1727_v62, %v1735_v11  ;;  %v1738_v34 = vmul.f32 %v1736_v10, %v1736_v10 }
0x1302   :  { %v1740_v45 = vsel %vm68_vm1, %v1738_v34, 0.0  ;;  %v1739_v49 = vmul.f32 %v1737_v43, %v1737_v43 }
0x1303   :  { %1741 = vadd.xlane.f32.xlu0 %v1740_v45 }
0x1304   :  { %v1743_v0 = vsel %vm68_vm1, %v1739_v49, 0.0 }
0x1307   :  { %1744 = vadd.xlane.f32.xlu0 %v1743_v0 }
0x1390   :  { %v1742_v13 = vpop.xlane.xlu0 %1741 }
0x1391   :  { %v1746_v39 = vmul.f32 0.03125, %v1742_v13 }
0x1393   :  { %v1748_v53 = vadd.f32 1e-05, %v1746_v39 }
0x1394   :  { %v1745_v14 = vpop.xlane.xlu0 %1744 }
0x1395   :  { %2221 = vrsqrt.f32 %v1748_v53  ;;  %v1747_v15 = vmul.f32 0.03125, %v1745_v14 }
0x1397   :  { %v1749_v18 = vadd.f32 1e-05, %v1747_v15 }
0x1399   :  { %2223 = vrsqrt.f32 %v1749_v18 }
0x139f   :  { %v2222_v29 = vpop.eup %2221 }
0x13a0   :  { %v1752_v31 = vmul.f32 %v2222_v29, %v1736_v10 }
0x13a2   :  { %v1758_v20 = vmul.f32 %v1757_v4, %v1752_v31 }
0x13a3   :  { %v2224_v22 = vpop.eup %2223 }
0x13a4   :  { %v1764_v23 = vadd.f32 %v1763_v28, %v1758_v20  ;;  %v1753_v52 = vmul.f32 %v2224_v22, %v1737_v43 }
0x13a6   :  { %v1766_v2 = vsel %vm68_vm1, %v1764_v23, 0.0  ;;  %v1759_v6 = vmul.f32 %v1757_v4, %v1753_v52 }
0x13a7   :  { %1767 = vadd.xlane.f32.xlu1 %v1766_v2 }
0x13a8   :  { %v1765_v24 = vadd.f32 %v1763_v28, %v1759_v6 }
0x13aa   :  { %v1769_v51 = vsel %vm68_vm1, %v1765_v24, 0.0 }
0x13ab   :  { %1770 = vadd.xlane.f32.xlu0 %v1769_v51 }
0x1434   :  { %v1768_v56 = vpop.xlane.xlu1 %1767 }
0x1435   :  { %v1772_v35 = vmul.f32 0.03125, %v1768_v56 }
0x1437   :  { %v1774_v25 = vsub.f32 %v1764_v23, %v1772_v35 }
0x1438   :  { %v1771_v63 = vpop.xlane.xlu0 %1770 }
0x1439   :  { %v1773_v26 = vmul.f32 0.03125, %v1771_v63  ;;  %v1776_v7 = vmul.f32 %v1774_v25, %v1774_v25 }
0x143b   :  { %v1775_v12 = vsub.f32 %v1765_v24, %v1773_v26  ;;  %v1778_v40 = vsel %vm68_vm1, %v1776_v7, 0.0 }
0x143c   :  { %1779 = vadd.xlane.f32.xlu1 %v1778_v40 }
0x143d   :  { %v1777_v55 = vmul.f32 %v1775_v12, %v1775_v12 }
0x143f   :  { %v1781_v27 = vsel %vm68_vm1, %v1777_v55, 0.0 }
0x1440   :  { %1782 = vadd.xlane.f32.xlu0 %v1781_v27 }
0x14c9   :  { %v1780_v17 = vpop.xlane.xlu1 %1779 }
0x14ca   :  { %v1784_v33 = vmul.f32 0.03125, %v1780_v17 }
0x14cc   :  { %v1786_v36 = vadd.f32 1e-05, %v1784_v33 }
0x14cd   :  { %v1783_v16 = vpop.xlane.xlu0 %1782 }
0x14ce   :  { %2225 = vrsqrt.f32 %v1786_v36  ;;  %v1785_v5 = vmul.f32 0.03125, %v1783_v16 }
0x14d0   :  { %v1787_v41 = vadd.f32 1e-05, %v1785_v5 }
0x14d2   :  { %2227 = vrsqrt.f32 %v1787_v41 }
0x14d8   :  { %v2226_v42 = vpop.eup %2225 }
0x14d9   :  { %v1790_v44 = vmul.f32 %v2226_v42, %v1774_v25 }
0x14db   :  { %v1796_v47 = vmul.f32 %v1795_v21, %v1790_v44 }
0x14dc   :  { %v2228_v57 = vpop.eup %2227 }
0x14dd   :  { %v1791_v1 = vmul.f32 %v2228_v57, %v1775_v12  ;;  %v1802_v50 = vadd.f32 %v1801_v37, %v1796_v47 }
0x14df   :  { %v1797_v58 = vmul.f32 %v1795_v21, %v1791_v1  ;;  %1804 = vst.msk [vmem:[#allocation2] sm:$0xff] %vm68_vm1, %v1802_v50 }
0x14e1   :  { %v1803_v46 = vadd.f32 %v1801_v37, %v1797_v58 }
0x14e3   :  { %1805 = vst.msk [vmem:[#allocation2 + $0x8] sm:$0xff] %vm68_vm1, %v1803_v46 }
0x14e4   :  { %2240 = shalt.err (!%p2237_p4)
}
0x14e5   :  { %s2241_s8 = scalar_lea.hbm %s2801_s5, 256 }
0x14e6   :  { %p2242_p5 = scmp.ne.s32.totalorder %s2801_s5, %s2241_s8  ;;  %p2245_p6 = scmp.lt.u32.totalorder %s2241_s8, %s2801_s5 }
0x14e8   :  { %p2247_p7 = pnand %p2245_p6, %p2242_p5 }
0x14ea   :  { %2250 = shalt.err (!%p2247_p7)
}
0x14eb   :  { %s2271_s13 = smov 128  }
0x14ec   :  { %1817 = dma.vmem_to_hbm [thread:$0]  %s1812_s30, 256, %s2801_s5, [#allocation3], %s2271_s13, %s2271_s13, %s2267_s14  }
0x14ed   :  { %2251 = dma.done.wait [#allocation3], 256  }
0x14ee   :  { %2252 = vsyncadd [#allocation3], 4294967040 }
0x14ef   :  { %1821 = vsyncpa [#allocation3], 1 }

</bundles_post_ra>
